<compile_context>
chip_gen: v6e
topology: v6e:2x2x1
jax: 0.10.0
libtpu: 0.0.40
codegen_flags: <defaults>
</compile_context>

<pallas_src>
import jax
import jax.numpy as jnp
from jax.experimental import pallas as pl
from jax.experimental.pallas import tpu as pltpu

LN_EPS = 1e-5      # nn.LayerNorm default eps
FEAT_EPS = 1e-4    # performer softmax_kernel eps


def _mhfa_kernel(x_ref, gamma_ref, beta_ref, projT_ref, o_ref):
    """One grid step = `block_b` batch elements.

    x_ref          : (Bb, N, D) VMEM
    gamma/beta_ref : (1, D)     VMEM
    projT_ref      : (D, F)     VMEM (pre-transposed, pre-scaled by D**-0.25)
    o_ref          : (Bb, N, D) VMEM
    """
    x = x_ref[...]
    g = gamma_ref[...]
    b = beta_ref[...]
    bb, n, d = x.shape
    f = projT_ref.shape[1]

    # ---- LayerNorm (biased variance, like torch.nn.LayerNorm) ----
    mu = jnp.mean(x, axis=-1, keepdims=True)
    xc = x - mu
    var = jnp.mean(xc * xc, axis=-1, keepdims=True)
    xn = xc * jax.lax.rsqrt(var + LN_EPS) * g + b                   # (Bb, N, D)

    # ---- performer softmax_kernel feature map (f32; protects exp accuracy,
    # K = D = 8 so the f32 MXU cost is negligible) ----
    dd = jax.lax.dot_general(
        xn.reshape(bb * n, d), projT_ref[...],
        dimension_numbers=(((1,), (0,)), ((), ())),
        preferred_element_type=jnp.float32).reshape(bb, n, f)       # (Bb, N, F)

    diag = jnp.sum(xn * xn, axis=-1, keepdims=True) * (0.5 * d ** -0.5)
    row_max = jnp.max(dd, axis=-1, keepdims=True)                   # (Bb, N, 1)
    gmax = jnp.max(row_max, axis=1, keepdims=True)                  # (Bb, 1, 1)

    # One big exp; k' reuses it via a cheap (Bb,N,1) correction factor.
    # The reference's ratio = F**-0.5 is dropped on both q' and k': any constant
    # scale cancels exactly between numerator and denominator.
    # (Rows far below gmax underflow k' to ~eps, same as the reference's direct
    # exp(dd - diag - gmax) underflow.)
    e = jnp.exp(dd - diag - row_max)                                # (Bb, N, F)
    q_p = e + FEAT_EPS
    k_p = e * jnp.exp(row_max - gmax) + FEAT_EPS

    # ---- linear (non-causal) attention with the denominator folded into the
    # MXU: v gets an all-ones row, so ctx row D is k_cumsum and out_aug row D is
    # the denominator (the extra MXU row is free; MXU is idle here anyway). ----
    xn_t = jnp.swapaxes(xn, 1, 2)                                   # (Bb, D, N)
    v_aug = jnp.concatenate(
        [xn_t, jnp.ones((bb, 1, n), dtype=xn.dtype)], axis=1)       # (Bb, D+1, N)

    # bf16 MXU operands with f32 accumulation.
    v_bf = v_aug.astype(jnp.bfloat16)
    k_bf = k_p.astype(jnp.bfloat16)
    q_bf = q_p.astype(jnp.bfloat16)

    # ctx[b,d,f] = sum_n v_aug[b,d,n] * k'[b,n,f]  — both operands in native MXU
    # orientation (no relayout of the big (N,F) k' tile).
    ctx = jnp.einsum('bdn,bnf->bdf', v_bf, k_bf,
                     preferred_element_type=jnp.float32)            # (Bb, D+1, F)

    # out_aug[b,n,d] = sum_f q'[b,n,f] * ctx[b,d,f] — q' is the LHS contracting
    # its minor dim (no big transpose); only the tiny (D+1,F) ctx is relaid out.
    out_aug = jnp.einsum('bnf,bdf->bnd', q_bf, ctx.astype(jnp.bfloat16),
                         preferred_element_type=jnp.float32)        # (Bb, N, D+1)

    num = out_aug[..., :d]                                          # (Bb, N, D)
    den = out_aug[..., d:d + 1]                                     # (Bb, N, 1)
    o_ref[...] = (num * pl.reciprocal(den, approx=True)).astype(o_ref.dtype)


def _pick_block_b(batch, n, f, d, vmem_budget_bytes=20 << 20):
    """VMEM-budgeted batch block; prefer >= 2 (even) grid steps for v7x's 2 TCs."""
    # rough per-batch-element temp footprint: ~5 f32 + 2 bf16 (Bb,N,F) live temps
    per_b = 5 * n * f * 4 + 2 * n * f * 2 + 6 * n * (d + 1) * 4
    cap = max(1, min(8, vmem_budget_bytes // per_b))
    divisors = [bb for bb in range(1, batch + 1)
                if batch % bb == 0 and bb <= cap]
    even_steps = [bb for bb in divisors if (batch // bb) % 2 == 0]
    multi_steps = [bb for bb in divisors if (batch // bb) >= 2]
    pool = even_steps or multi_steps or divisors
    return max(pool)
    # TODO(synk): for very long sequences (large N) even block_b=1 can exceed the
    # v7x 64 MiB VMEM; that regime needs an internal N-chunked two-pass kernel.


def multihead_fast_attention_block(x, gamma, beta, proj, num_heads,
                                   block_b=None):
    """x: (B, N, D) f32 -> (B, num_heads, N, D) f32 (all heads identical)."""
    B, N, D = x.shape
    F = proj.shape[0]
    if block_b is None:
        block_b = _pick_block_b(B, N, F, D)
    assert B % block_b == 0

    # Fold the performer data_normalizer (D**-0.25) into the projection once and
    # pre-transpose to (D, F): the in-kernel dot then contracts proj's major dim
    # (no relayout) and the RHS is lane-dense over F.
    projT_scaled = (proj.T * (D ** -0.25)).astype(x.dtype)

    # Scoped-VMEM limit sized to the (Bb,N,F) temps (v5e's default is only 16 MiB;
    # keep below v7x's 64 MiB physical VMEM).
    temp_bytes = block_b * (5 * N * F * 4 + 2 * N * F * 2)
    io_bytes = 2 * 2 * block_b * N * D * 4          # double-buffered in + out
    vmem_limit = int(min(48 << 20, max(32 << 20, 3 * (temp_bytes + io_bytes))))

    out = pl.pallas_call(
        _mhfa_kernel,
        out_shape=jax.ShapeDtypeStruct((B, N, D), x.dtype),
        grid_spec=pltpu.PrefetchScalarGridSpec(
            num_scalar_prefetch=0,
            grid=(B // block_b,),
            in_specs=[
                pl.BlockSpec((block_b, N, D), lambda bi: (bi, 0, 0)),
                pl.BlockSpec((1, D), lambda bi: (0, 0)),
                pl.BlockSpec((1, D), lambda bi: (0, 0)),
                pl.BlockSpec((D, F), lambda bi: (0, 0)),
            ],
            out_specs=pl.BlockSpec((block_b, N, D), lambda bi: (bi, 0, 0)),
        ),
        compiler_params=pltpu.CompilerParams(
            dimension_semantics=("parallel",),
            vmem_limit_bytes=vmem_limit),
    )(x, gamma, beta, projT_scaled)

    # Module contract: (B, H, N, D) with identical heads (q = k = v, shared
    # params).  NOTE: this broadcast materializes H copies in HBM — consumers
    # that can take (B, N, D) should use `out` directly.
    return jnp.broadcast_to(out[:, None], (B, num_heads, N, D))


# ---------------- parameter init (plain JAX glue, not in the kernel) ----------

def gaussian_orthogonal_random_matrix(nb_rows, nb_cols, key):
    """Performer gaussian_orthogonal_random_matrix with scaling=0."""
    k_blocks, k_mult = jax.random.split(key)
    nb_full_blocks = nb_rows // nb_cols
    keys = jax.random.split(k_blocks, nb_full_blocks + 1)
    blocks = []
    for i in range(nb_full_blocks):
        unstructured = jax.random.normal(keys[i], (nb_cols, nb_cols),
                                         dtype=jnp.float32)
        q, _ = jnp.linalg.qr(unstructured)
        blocks.append(q.T)
    rem = nb_rows - nb_full_blocks * nb_cols
    if rem > 0:
        unstructured = jax.random.normal(keys[-1], (nb_cols, nb_cols),
                                         dtype=jnp.float32)
        q, _ = jnp.linalg.qr(unstructured)
        blocks.append(q.T[:rem])
    final = jnp.concatenate(blocks, axis=0)
    multiplier = jnp.linalg.norm(
        jax.random.normal(k_mult, (nb_rows, nb_cols), dtype=jnp.float32),
        axis=1)
    return multiplier[:, None] * final


# ---------------- pure-JAX reference for validation ----------------

def _reference(x, gamma, beta, proj, num_heads):
    mu = jnp.mean(x, axis=-1, keepdims=True)
    var = jnp.mean((x - mu) ** 2, axis=-1, keepdims=True)
    xn = (x - mu) * jax.lax.rsqrt(var + LN_EPS) * gamma + beta       # (B,N,D)
    data = jnp.broadcast_to(xn[:, None], (x.shape[0], num_heads) + xn.shape[1:])
    d = data.shape[-1]
    f = proj.shape[0]
    dn = d ** -0.25
    ratio = f ** -0.5
    data_dash = jnp.einsum('bhnd,fd->bhnf', dn * data, proj)
    diag = jnp.sum(data ** 2, axis=-1, keepdims=True) * 0.5 * dn * dn
    q_p = ratio * (jnp.exp(data_dash - diag
                           - jnp.max(data_dash, axis=-1, keepdims=True))
                   + FEAT_EPS)
    k_p = ratio * (jnp.exp(data_dash - diag
                           - jnp.max(data_dash, axis=(-1, -2), keepdims=True))
                   + FEAT_EPS)
    v = data
    k_cumsum = jnp.sum(k_p, axis=-2)                                 # (B,H,F)
    d_inv = 1.0 / jnp.einsum('bhnf,bhf->bhn', q_p, k_cumsum)
    context = jnp.einsum('bhnf,bhne->bhfe', k_p, v)
    out = jnp.einsum('bhfe,bhnf,bhn->bhne', context, q_p, d_inv)
    return out


if __name__ == "__main__":
    # Small, self-consistent shapes: the module's forward only works when
    # embedding_dim == FastAttention dim_heads (= 8), so embedding_dim = 8.
    B, N, EMBED, HEADS, NB_FEATURES = 2, 128, 8, 4, 256

    key = jax.random.PRNGKey(0)
    k_x, k_proj, k_g, k_b = jax.random.split(key, 4)

    x = jax.random.normal(k_x, (B, N, EMBED), dtype=jnp.float32)
    gamma = 1.0 + 0.1 * jax.random.normal(k_g, (1, EMBED), dtype=jnp.float32)
    beta = 0.05 * jax.random.normal(k_b, (1, EMBED), dtype=jnp.float32)
    proj = gaussian_orthogonal_random_matrix(NB_FEATURES, EMBED, k_proj)

    out = multihead_fast_attention_block(x, gamma, beta, proj, HEADS)
    out = jax.block_until_ready(out)

    ref = jax.block_until_ready(_reference(x, gamma, beta, proj, HEADS))
    assert out.shape == (B, HEADS, N, EMBED)
    max_err = float(jnp.max(jnp.abs(out - ref)))
    assert jnp.allclose(out, ref, atol=5e-2, rtol=5e-2), max_err

    print("KERNEL_OK")
</pallas_src>

<mosaic_0001>
module attributes {stable_mosaic.version = 11 : i64} {
  func.func @_mhfa_kernel(%arg0: i32, %arg1: memref<1x128x8xf32, #tpu.memory_space<vmem>>, %arg2: memref<1x8xf32, #tpu.memory_space<vmem>>, %arg3: memref<1x8xf32, #tpu.memory_space<vmem>>, %arg4: memref<8x256xf32, #tpu.memory_space<vmem>>, %arg5: memref<1x128x8xf32, #tpu.memory_space<vmem>>) attributes {dimension_semantics = [#tpu.dimension_semantics<parallel>], iteration_bounds = array<i64: 2>, scalar_prefetch = 0 : i64, scratch_operands = 0 : i64, tpu.core_type = #tpu.core_type<tc>, window_params = [{transform_indices = @transform_0, window_bounds = array<i64: 1, 128, 8>}, {pipeline_mode = #tpu.pipeline_mode<synchronous>, transform_indices = @transform_1, window_bounds = array<i64: 1, 8>}, {pipeline_mode = #tpu.pipeline_mode<synchronous>, transform_indices = @transform_2, window_bounds = array<i64: 1, 8>}, {pipeline_mode = #tpu.pipeline_mode<synchronous>, transform_indices = @transform_3, window_bounds = array<i64: 8, 256>}, {transform_indices = @transform_4, window_bounds = array<i64: 1, 128, 8>}]} {
    %c0 = arith.constant 0 : index
    %c0_0 = arith.constant 0 : index
    %c0_1 = arith.constant 0 : index
    %0 = vector.load %arg1[%c0, %c0_0, %c0_1] : memref<1x128x8xf32, #tpu.memory_space<vmem>>, vector<1x128x8xf32>
    %c0_2 = arith.constant 0 : index
    %c0_3 = arith.constant 0 : index
    %1 = vector.load %arg2[%c0_2, %c0_3] : memref<1x8xf32, #tpu.memory_space<vmem>>, vector<1x8xf32>
    %c0_4 = arith.constant 0 : index
    %c0_5 = arith.constant 0 : index
    %2 = vector.load %arg3[%c0_4, %c0_5] : memref<1x8xf32, #tpu.memory_space<vmem>>, vector<1x8xf32>
    %cst = arith.constant dense<0.000000e+00> : vector<1x128xf32>
    %3 = vector.multi_reduction <add>, %0, %cst [2] : vector<1x128x8xf32> to vector<1x128xf32>
    %4 = vector.shape_cast %3 : vector<1x128xf32> to vector<1x128x1xf32>
    %cst_6 = arith.constant 8.000000e+00 : f32
    %5 = vector.broadcast %cst_6 : f32 to vector<1x128x1xf32>
    %6 = arith.divf %4, %5 : vector<1x128x1xf32>
    %7 = vector.broadcast %6 : vector<1x128x1xf32> to vector<1x128x8xf32>
    %8 = arith.subf %0, %7 : vector<1x128x8xf32>
    %9 = arith.mulf %8, %8 : vector<1x128x8xf32>
    %cst_7 = arith.constant dense<0.000000e+00> : vector<1x128xf32>
    %10 = vector.multi_reduction <add>, %9, %cst_7 [2] : vector<1x128x8xf32> to vector<1x128xf32>
    %11 = vector.shape_cast %10 : vector<1x128xf32> to vector<1x128x1xf32>
    %cst_8 = arith.constant 8.000000e+00 : f32
    %12 = vector.broadcast %cst_8 : f32 to vector<1x128x1xf32>
    %13 = arith.divf %11, %12 : vector<1x128x1xf32>
    %cst_9 = arith.constant 9.99999974E-6 : f32
    %14 = vector.broadcast %cst_9 : f32 to vector<1x128x1xf32>
    %15 = arith.addf %13, %14 : vector<1x128x1xf32>
    %16 = math.rsqrt %15 : vector<1x128x1xf32>
    %17 = vector.broadcast %16 : vector<1x128x1xf32> to vector<1x128x8xf32>
    %18 = arith.mulf %8, %17 : vector<1x128x8xf32>
    %19 = vector.shape_cast %1 : vector<1x8xf32> to vector<1x1x8xf32>
    %20 = vector.broadcast %19 : vector<1x1x8xf32> to vector<1x128x8xf32>
    %21 = arith.mulf %18, %20 : vector<1x128x8xf32>
    %22 = vector.shape_cast %2 : vector<1x8xf32> to vector<1x1x8xf32>
    %23 = vector.broadcast %22 : vector<1x1x8xf32> to vector<1x128x8xf32>
    %24 = arith.addf %21, %23 : vector<1x128x8xf32>
    %25 = vector.shape_cast %24 : vector<1x128x8xf32> to vector<128x8xf32>
    %c0_10 = arith.constant 0 : index
    %c0_11 = arith.constant 0 : index
    %26 = vector.load %arg4[%c0_10, %c0_11] : memref<8x256xf32, #tpu.memory_space<vmem>>, vector<8x256xf32>
    %cst_12 = arith.constant dense<0.000000e+00> : vector<128x256xf32>
    %27 = tpu.matmul %25, %26, %cst_12 {dimension_numbers = #tpu.dot_dimension_numbers<[1], [0], [0], [1], [0, 0, 1, 1], [], []>} : vector<128x8xf32>, vector<8x256xf32>, vector<128x256xf32> -> vector<128x256xf32>
    %28 = vector.shape_cast %27 : vector<128x256xf32> to vector<1x128x256xf32>
    %29 = arith.mulf %24, %24 : vector<1x128x8xf32>
    %cst_13 = arith.constant dense<0.000000e+00> : vector<1x128xf32>
    %30 = vector.multi_reduction <add>, %29, %cst_13 [2] : vector<1x128x8xf32> to vector<1x128xf32>
    %31 = vector.shape_cast %30 : vector<1x128xf32> to vector<1x128x1xf32>
    %cst_14 = arith.constant 0.176776692 : f32
    %32 = vector.broadcast %cst_14 : f32 to vector<1x128x1xf32>
    %33 = arith.mulf %31, %32 : vector<1x128x1xf32>
    %cst_15 = arith.constant dense<0xFF800000> : vector<1x128xf32>
    %34 = vector.multi_reduction <maximumf>, %28, %cst_15 [2] : vector<1x128x256xf32> to vector<1x128xf32>
    %35 = vector.shape_cast %34 : vector<1x128xf32> to vector<1x128x1xf32>
    %cst_16 = arith.constant dense<0xFF800000> : vector<1x1xf32>
    %36 = vector.multi_reduction <maximumf>, %35, %cst_16 [1] : vector<1x128x1xf32> to vector<1x1xf32>
    %37 = vector.shape_cast %36 : vector<1x1xf32> to vector<1x1x1xf32>
    %38 = vector.broadcast %33 : vector<1x128x1xf32> to vector<1x128x256xf32>
    %39 = arith.subf %28, %38 : vector<1x128x256xf32>
    %40 = vector.broadcast %35 : vector<1x128x1xf32> to vector<1x128x256xf32>
    %41 = arith.subf %39, %40 : vector<1x128x256xf32>
    %42 = math.exp %41 : vector<1x128x256xf32>
    %cst_17 = arith.constant 9.99999974E-5 : f32
    %43 = vector.broadcast %cst_17 : f32 to vector<1x128x256xf32>
    %44 = arith.addf %42, %43 : vector<1x128x256xf32>
    %45 = vector.broadcast %37 : vector<1x1x1xf32> to vector<1x128x1xf32>
    %46 = arith.subf %35, %45 : vector<1x128x1xf32>
    %47 = math.exp %46 : vector<1x128x1xf32>
    %48 = vector.broadcast %47 : vector<1x128x1xf32> to vector<1x128x256xf32>
    %49 = arith.mulf %42, %48 : vector<1x128x256xf32>
    %cst_18 = arith.constant 9.99999974E-5 : f32
    %50 = vector.broadcast %cst_18 : f32 to vector<1x128x256xf32>
    %51 = arith.addf %49, %50 : vector<1x128x256xf32>
    %52 = tpu.transpose %24, [0, 2, 1] : vector<1x128x8xf32> -> vector<1x8x128xf32>
    %cst_19 = arith.constant 1.000000e+00 : f32
    %53 = vector.broadcast %cst_19 : f32 to vector<1x1x128xf32>
    %54 = tpu.concatenate %52, %53 in 1 : vector<1x8x128xf32>, vector<1x1x128xf32> -> vector<1x9x128xf32>
    %55 = arith.truncf %54 : vector<1x9x128xf32> to vector<1x9x128xbf16>
    %56 = arith.truncf %51 : vector<1x128x256xf32> to vector<1x128x256xbf16>
    %57 = arith.truncf %44 : vector<1x128x256xf32> to vector<1x128x256xbf16>
    "tpu.trace_start"() <{level = 10 : i32, message = "bdn,bnf->bdf"}> : () -> ()
    %cst_20 = arith.constant dense<0.000000e+00> : vector<1x9x256xf32>
    %58 = tpu.matmul %55, %56, %cst_20 {dimension_numbers = #tpu.dot_dimension_numbers<[2], [1], [1], [2], [0, 0, 0, 1, 1, 2], [0], [0]>} : vector<1x9x128xbf16>, vector<1x128x256xbf16>, vector<1x9x256xf32> -> vector<1x9x256xf32>
    "tpu.trace_stop"() : () -> ()
    %59 = arith.truncf %58 : vector<1x9x256xf32> to vector<1x9x256xbf16>
    "tpu.trace_start"() <{level = 10 : i32, message = "bnf,bdf->bnd"}> : () -> ()
    %cst_21 = arith.constant dense<0.000000e+00> : vector<1x128x9xf32>
    %60 = tpu.matmul %57, %59, %cst_21 {dimension_numbers = #tpu.dot_dimension_numbers<[2], [2], [1], [1], [0, 0, 0, 1, 1, 1], [0], [0]>} : vector<1x128x256xbf16>, vector<1x9x256xbf16>, vector<1x128x9xf32> -> vector<1x128x9xf32>
    "tpu.trace_stop"() : () -> ()
    %61 = vector.extract_strided_slice %60 {offsets = [0, 0, 0], sizes = [1, 128, 8], strides = [1, 1, 1]} : vector<1x128x9xf32> to vector<1x128x8xf32>
    %62 = vector.extract_strided_slice %60 {offsets = [0, 0, 8], sizes = [1, 128, 1], strides = [1, 1, 1]} : vector<1x128x9xf32> to vector<1x128x1xf32>
    %63 = tpu.reciprocal %62 {approx = true} : vector<1x128x1xf32> -> vector<1x128x1xf32>
    %64 = vector.broadcast %63 : vector<1x128x1xf32> to vector<1x128x8xf32>
    %65 = arith.mulf %61, %64 : vector<1x128x8xf32>
    %c0_22 = arith.constant 0 : index
    %c0_23 = arith.constant 0 : index
    %c0_24 = arith.constant 0 : index
    %66 = vector.load %arg5[%c0_22, %c0_23, %c0_24] : memref<1x128x8xf32, #tpu.memory_space<vmem>>, vector<1x128x8xf32>
    tpu.vector_store %arg5[%c0_22, %c0_23, %c0_24], %65 {strides = array<i32>} : memref<1x128x8xf32, #tpu.memory_space<vmem>>, vector<1x128x8xf32>,
    return
  }
  func.func @transform_0(%arg0: i32) -> (i32, i32, i32) {
    %c0_i32 = arith.constant 0 : i32
    %c0_i32_0 = arith.constant 0 : i32
    %c0_i32_1 = arith.constant 0 : i32
    return %arg0, %c0_i32, %c0_i32_0 : i32, i32, i32
  }
  func.func @transform_1(%arg0: i32) -> (i32, i32) {
    %c0_i32 = arith.constant 0 : i32
    %c0_i32_0 = arith.constant 0 : i32
    %c0_i32_1 = arith.constant 0 : i32
    return %c0_i32, %c0_i32_0 : i32, i32
  }
  func.func @transform_2(%arg0: i32) -> (i32, i32) {
    %c0_i32 = arith.constant 0 : i32
    %c0_i32_0 = arith.constant 0 : i32
    %c0_i32_1 = arith.constant 0 : i32
    return %c0_i32, %c0_i32_0 : i32, i32
  }
  func.func @transform_3(%arg0: i32) -> (i32, i32) {
    %c0_i32 = arith.constant 0 : i32
    %c0_i32_0 = arith.constant 0 : i32
    %c0_i32_1 = arith.constant 0 : i32
    return %c0_i32, %c0_i32_0 : i32, i32
  }
  func.func @transform_4(%arg0: i32) -> (i32, i32, i32) {
    %c0_i32 = arith.constant 0 : i32
    %c0_i32_0 = arith.constant 0 : i32
    %c0_i32_1 = arith.constant 0 : i32
    return %arg0, %c0_i32, %c0_i32_0 : i32, i32, i32
  }
}

</mosaic_0001>

<bundles_post_ra>
// kernel: tpu_custom_call.1
= control target key start
LH: loop header
LB: loop body
LE: loop exit
PB: predicated region body
PF: predicated region fallthrough
CT: control target
= control target key end

     0   :  { %s1735_s15 = smov 0   ;;  %s2653_s0 = inlined_call_operand.vmem [shape: f32[2,128,8], index: 0, kind: input, shape index: {}]   ;;  %s2654_s1 = inlined_call_operand.vmem [shape: f32[1,8], index: 1, kind: input, shape index: {}]   ;;  %s2655_s2 = inlined_call_operand.vmem [shape: f32[1,8], index: 2, kind: input, shape index: {}]   ;;  %s2656_s3 = inlined_call_operand.vmem [shape: f32[8,256], index: 3, kind: input, shape index: {}]   ;;  %s2657_s4 = inlined_call_operand.vmem [shape: f32[2,128,8], index: 4, kind: output, shape index: {}]  }
   0x1 LB: > { %s1493_s16 = sadd.s32 4294967295, %s1704_s15   ;;  %p1497_p0 = scmp.ge.s32.totalorder %s1704_s15, 1  ;;  %s1704_s15 = sphi %s1735_s15, %s14_s15  }
   0x2   : > { %p162_p1 = scmp.lt.s32.totalorder %s1704_s15, 3 }
   0x4   : > { %p163_p2 = pnand %p1497_p0, %p162_p1 }
   0x6   : > { %166 = sbr.rel (%p163_p2) target bundleno = 1420 (0x58c), region = 36 }
   0xb   : > { %p188_p3 = scmp.lt.s32.totalorder %s1493_s16, 1  ;;  %vm217_vm0 = vcmask 64512  }
   0xd   : > { %s2710_s16 = smov (!%p188_p3, %s1493_s16), 1 }
   0xe   : > { %s1522_s17 = sshll.u32 %s2710_s16, 7 }
   0xf   : > { %s1751_s20 = scalar_lea.vmem %s2653_s0, %s1522_s17  ;;  %s2603_s5 = scalar_lea.vmem %s2657_s4, %s1522_s17 }
  0x10   : > { %v199_v0 = vld [vmem:[%s1751_s20] sm:$0xff]  ;;  %v201_v1 = vld [vmem:[%s1751_s20 + $0x10] sm:$0xff]  ;;  %v200_v2 = vld [vmem:[%s1751_s20 + $0x8] sm:$0xff] }
  0x11   : > { %v218_v3 = vsel %vm217_vm0, %v199_v0, 0.0  ;;  %v224_v4 = vsel %vm217_vm0, %v201_v1, 0.0  ;;  %v202_v5 = vld [vmem:[%s1751_s20 + $0x18] sm:$0xff]  ;;  %v221_v6 = vsel %vm217_vm0, %v200_v2, 0.0  ;;  %v203_v8 = vld [vmem:[%s1751_s20 + $0x20] sm:$0xff]  ;;  %v204_v9 = vld [vmem:[%s1751_s20 + $0x28] sm:$0xff] }
  0x12   : > { %219 = vadd.xlane.f32.xlu0 %v218_v3  ;;  %225 = vadd.xlane.f32.xlu1 %v224_v4  ;;  %v227_v7 = vsel %vm217_vm0, %v202_v5, 0.0  ;;  %v230_v10 = vsel %vm217_vm0, %v203_v8, 0.0  ;;  %v233_v11 = vsel %vm217_vm0, %v204_v9, 0.0  ;;  %v1766_v12 = vld [vmem:[%s1751_s20 + $0x30] sm:$0xff]  ;;  %v1769_v13 = vld [vmem:[%s1751_s20 + $0x38] sm:$0xff]  ;;  %v1776_v16 = vld [vmem:[%s1751_s20 + $0x40] sm:$0xff] }
  0x13   : > { %v236_v14 = vsel %vm217_vm0, %v1766_v12, 0.0  ;;  %v239_v15 = vsel %vm217_vm0, %v1769_v13, 0.0  ;;  %v1779_v17 = vld [vmem:[%s1751_s20 + $0x48] sm:$0xff]  ;;  %v242_v18 = vsel %vm217_vm0, %v1776_v16, 0.0  ;;  %v1786_v20 = vld [vmem:[%s1751_s20 + $0x50] sm:$0xff]  ;;  %v1789_v21 = vld [vmem:[%s1751_s20 + $0x58] sm:$0xff] }
  0x14   : > { %v245_v19 = vsel %vm217_vm0, %v1779_v17, 0.0  ;;  %v248_v22 = vsel %vm217_vm0, %v1786_v20, 0.0  ;;  %v251_v23 = vsel %vm217_vm0, %v1789_v21, 0.0  ;;  %v1796_v24 = vld [vmem:[%s1751_s20 + $0x60] sm:$0xff]  ;;  %v1799_v25 = vld [vmem:[%s1751_s20 + $0x68] sm:$0xff]  ;;  %v1806_v28 = vld [vmem:[%s1751_s20 + $0x70] sm:$0xff] }
  0x15   : > { %v254_v26 = vsel %vm217_vm0, %v1796_v24, 0.0  ;;  %v257_v27 = vsel %vm217_vm0, %v1799_v25, 0.0  ;;  %v1809_v29 = vld [vmem:[%s1751_s20 + $0x78] sm:$0xff]  ;;  %v260_v30 = vsel %vm217_vm0, %v1806_v28, 0.0 }
  0x16   : > { %222 = vadd.xlane.f32.xlu0 %v221_v6  ;;  %228 = vadd.xlane.f32.xlu1 %v227_v7  ;;  %v263_v31 = vsel %vm217_vm0, %v1809_v29, 0.0 }
  0x1a   : > { %231 = vadd.xlane.f32.xlu0 %v230_v10  ;;  %234 = vadd.xlane.f32.xlu1 %v233_v11 }
  0x1e   : > { %237 = vadd.xlane.f32.xlu0 %v236_v14  ;;  %240 = vadd.xlane.f32.xlu1 %v239_v15 }
  0x22   : > { %243 = vadd.xlane.f32.xlu0 %v242_v18  ;;  %246 = vadd.xlane.f32.xlu1 %v245_v19 }
  0x26   : > { %249 = vadd.xlane.f32.xlu0 %v248_v22  ;;  %252 = vadd.xlane.f32.xlu1 %v251_v23 }
  0x2a   : > { %255 = vadd.xlane.f32.xlu0 %v254_v26  ;;  %258 = vadd.xlane.f32.xlu1 %v257_v27 }
  0x2e   : > { %261 = vadd.xlane.f32.xlu0 %v260_v30  ;;  %264 = vadd.xlane.f32.xlu1 %v263_v31 }
  0x9b   : > { %v220_v32 = vpop.xlane.xlu0 %219  ;;  %v226_v33 = vpop.xlane.xlu1 %225 }
  0x9c   : > { %v267_v34 = vmul.f32 0.125, %v220_v32  ;;  %v269_v35 = vmul.f32 0.125, %v226_v33 }
  0x9e   : > { %v1815_v36 = vsub.f32 %v199_v0, %v267_v34  ;;  %v1817_v37 = vsub.f32 %v201_v1, %v269_v35 }
  0x9f   : > { %v223_v38 = vpop.xlane.xlu0 %222  ;;  %v229_v39 = vpop.xlane.xlu1 %228 }
  0xa0   : > { %v268_v40 = vmul.f32 0.125, %v223_v38  ;;  %v270_v41 = vmul.f32 0.125, %v229_v39  ;;  %v299_v42 = vmul.f32 %v1815_v36, %v1815_v36  ;;  %v301_v43 = vmul.f32 %v1817_v37, %v1817_v37 }
  0xa2   : > { %v1823_v44 = vsub.f32 %v200_v2, %v268_v40  ;;  %v1825_v45 = vsub.f32 %v202_v5, %v270_v41  ;;  %v315_v46 = vsel %vm217_vm0, %v299_v42, 0.0  ;;  %v321_v49 = vsel %vm217_vm0, %v301_v43, 0.0 }
  0xa3   : > { %316 = vadd.xlane.f32.xlu0 %v315_v46  ;;  %v232_v47 = vpop.xlane.xlu0 %231  ;;  %v235_v48 = vpop.xlane.xlu1 %234 }
  0xa4   : > { %v271_v50 = vmul.f32 0.125, %v232_v47  ;;  %v272_v51 = vmul.f32 0.125, %v235_v48  ;;  %v300_v52 = vmul.f32 %v1823_v44, %v1823_v44  ;;  %v302_v53 = vmul.f32 %v1825_v45, %v1825_v45 }
  0xa6   : > { %v1833_v54 = vsub.f32 %v203_v8, %v271_v50  ;;  %v1835_v55 = vsub.f32 %v204_v9, %v272_v51  ;;  %v318_v56 = vsel %vm217_vm0, %v300_v52, 0.0  ;;  %v324_v59 = vsel %vm217_vm0, %v302_v53, 0.0  ;;  %v471_v53 = vld [vmem:[%s2656_s3] sm:$0xff] }
  0xa7   : > { %322 = vadd.xlane.f32.xlu0 %v321_v49  ;;  %319 = vadd.xlane.f32.xlu1 %v318_v56  ;;  %v238_v57 = vpop.xlane.xlu0 %237  ;;  %v241_v58 = vpop.xlane.xlu1 %240  ;;  %v1706_v56 = vmov 0.0  }
  0xa8   : > { %v273_v60 = vmul.f32 0.125, %v238_v57  ;;  %v274_v61 = vmul.f32 0.125, %v241_v58  ;;  %v303_v62 = vmul.f32 %v1833_v54, %v1833_v54  ;;  %v304_v63 = vmul.f32 %v1835_v55, %v1835_v55  ;;  %585 = vmatprep.mubr.f32.mxu0 %v1706_v56 }
  0xaa   : > { %v1844_v0 = vsub.f32 %v1766_v12, %v273_v60  ;;  %v1847_v1 = vsub.f32 %v1769_v13, %v274_v61  ;;  %v327_v2 = vsel %vm217_vm0, %v303_v62, 0.0  ;;  %v330_v5 = vsel %vm217_vm0, %v304_v63, 0.0 }
  0xab   : > { %325 = vadd.xlane.f32.xlu1 %v324_v59  ;;  %328 = vadd.xlane.f32.xlu0 %v327_v2  ;;  %v244_v3 = vpop.xlane.xlu0 %243  ;;  %v247_v4 = vpop.xlane.xlu1 %246 }
  0xac   : > { %v275_v6 = vmul.f32 0.125, %v244_v3  ;;  %v276_v7 = vmul.f32 0.125, %v247_v4  ;;  %v305_v8 = vmul.f32 %v1844_v0, %v1844_v0  ;;  %v306_v9 = vmul.f32 %v1847_v1, %v1847_v1 }
  0xae   : > { %v1856_v10 = vsub.f32 %v1776_v16, %v275_v6  ;;  %v1859_v11 = vsub.f32 %v1779_v17, %v276_v7  ;;  %v333_v12 = vsel %vm217_vm0, %v305_v8, 0.0  ;;  %v336_v15 = vsel %vm217_vm0, %v306_v9, 0.0 }
  0xaf   : > { %331 = vadd.xlane.f32.xlu1 %v330_v5  ;;  %334 = vadd.xlane.f32.xlu0 %v333_v12  ;;  %v250_v13 = vpop.xlane.xlu0 %249  ;;  %v253_v14 = vpop.xlane.xlu1 %252 }
  0xb0   : > { %v277_v18 = vmul.f32 0.125, %v250_v13  ;;  %v278_v19 = vmul.f32 0.125, %v253_v14  ;;  %v307_v22 = vmul.f32 %v1856_v10, %v1856_v10  ;;  %v308_v16 = vmul.f32 %v1859_v11, %v1859_v11 }
  0xb2   : > { %v1868_v23 = vsub.f32 %v1786_v20, %v277_v18  ;;  %v1871_v17 = vsub.f32 %v1789_v21, %v278_v19  ;;  %v339_v26 = vsel %vm217_vm0, %v307_v22, 0.0  ;;  %v342_v31 = vsel %vm217_vm0, %v308_v16, 0.0  ;;  %v1915_v16 = vld [vmem:[%s2654_s1] ss:$0 sm:$0xff] }
  0xb3   : > { %337 = vadd.xlane.f32.xlu1 %v336_v15  ;;  %340 = vadd.xlane.f32.xlu0 %v339_v26  ;;  %v256_v27 = vpop.xlane.xlu0 %255  ;;  %v259_v30 = vpop.xlane.xlu1 %258 }
  0xb4   : > { %v279_v32 = vmul.f32 0.125, %v256_v27  ;;  %v280_v33 = vmul.f32 0.125, %v259_v30  ;;  %v309_v34 = vmul.f32 %v1868_v23, %v1868_v23  ;;  %v310_v20 = vmul.f32 %v1871_v17, %v1871_v17 }
  0xb6   : > { %v1880_v35 = vsub.f32 %v1796_v24, %v279_v32  ;;  %v1883_v21 = vsub.f32 %v1799_v25, %v280_v33  ;;  %v345_v38 = vsel %vm217_vm0, %v309_v34, 0.0  ;;  %v348_v41 = vsel %vm217_vm0, %v310_v20, 0.0  ;;  %v1921_v32 = vld [vmem:[%s2655_s2] ss:$0 sm:$0xff] }
  0xb7   : > { %343 = vadd.xlane.f32.xlu1 %v342_v31  ;;  %346 = vadd.xlane.f32.xlu0 %v345_v38  ;;  %v262_v39 = vpop.xlane.xlu0 %261  ;;  %v265_v40 = vpop.xlane.xlu1 %264 }
  0xb8   : > { %v281_v42 = vmul.f32 0.125, %v262_v39  ;;  %v282_v43 = vmul.f32 0.125, %v265_v40  ;;  %v311_v46 = vmul.f32 %v1880_v35, %v1880_v35  ;;  %v312_v24 = vmul.f32 %v1883_v21, %v1883_v21 }
  0xba   : > { %v1892_v47 = vsub.f32 %v1806_v28, %v281_v42  ;;  %v1895_v25 = vsub.f32 %v1809_v29, %v282_v43  ;;  %v351_v48 = vsel %vm217_vm0, %v311_v46, 0.0  ;;  %v354_v49 = vsel %vm217_vm0, %v312_v24, 0.0  ;;  %v472_v29 = vld [vmem:[%s2656_s3 + $0x8] sm:$0xff] }
  0xbb   : > { %349 = vadd.xlane.f32.xlu1 %v348_v41  ;;  %352 = vadd.xlane.f32.xlu0 %v351_v48 }
  0xbc   : > { %v313_v50 = vmul.f32 %v1892_v47, %v1892_v47  ;;  %v314_v51 = vmul.f32 %v1895_v25, %v1895_v25  ;;  %551 = vmatprep.subr.mxu0 %v472_v29 }
  0xbd   : > { %552 = vmatpush1.msra.mxu0 %v471_v53 }
  0xbe   : > { %v357_v52 = vsel %vm217_vm0, %v313_v50, 0.0  ;;  %v360_v28 = vsel %vm217_vm0, %v314_v51, 0.0 }
  0xbf   : > { %355 = vadd.xlane.f32.xlu1 %v354_v49  ;;  %358 = vadd.xlane.f32.xlu0 %v357_v52 }
  0xc3   : > { %361 = vadd.xlane.f32.xlu1 %v360_v28 }
 0x12c   : > { %v317_v57 = vpop.xlane.xlu0 %316 }
 0x12d   : > { %v363_v58 = vmul.f32 0.125, %v317_v57 }
 0x12f   : > { %v379_v59 = vadd.f32 1e-05, %v363_v58 }
 0x130   : > { %v320_v60 = vpop.xlane.xlu1 %319  ;;  %v323_v61 = vpop.xlane.xlu0 %322 }
 0x131   : > { %1538 = vrsqrt.f32 %v379_v59  ;;  %v364_v62 = vmul.f32 0.125, %v320_v60  ;;  %v365_v63 = vmul.f32 0.125, %v323_v61 }
 0x133   : > { %v380_v2 = vadd.f32 1e-05, %v364_v62  ;;  %v381_v3 = vadd.f32 1e-05, %v365_v63 }
 0x134   : > { %v326_v4 = vpop.xlane.xlu1 %325  ;;  %v329_v5 = vpop.xlane.xlu0 %328 }
 0x135   : > { %1540 = vrsqrt.f32 %v380_v2  ;;  %v366_v6 = vmul.f32 0.125, %v326_v4  ;;  %v367_v7 = vmul.f32 0.125, %v329_v5 }
 0x136   : > { %1542 = vrsqrt.f32 %v381_v3 }
 0x137   : > { %v382_v8 = vadd.f32 1e-05, %v366_v6  ;;  %v383_v9 = vadd.f32 1e-05, %v367_v7 }
 0x138   : > { %v332_v12 = vpop.xlane.xlu1 %331  ;;  %v335_v13 = vpop.xlane.xlu0 %334 }
 0x139   : > { %1544 = vrsqrt.f32 %v382_v8  ;;  %v368_v14 = vmul.f32 0.125, %v332_v12  ;;  %v369_v18 = vmul.f32 0.125, %v335_v13 }
 0x13a   : > { %1546 = vrsqrt.f32 %v383_v9 }
 0x13b   : > { %v384_v15 = vadd.f32 1e-05, %v368_v14  ;;  %v385_v26 = vadd.f32 1e-05, %v369_v18 }
 0x13c   : > { %v338_v19 = vpop.xlane.xlu1 %337  ;;  %v341_v30 = vpop.xlane.xlu0 %340 }
 0x13d   : > { %1548 = vrsqrt.f32 %v384_v15  ;;  %v370_v27 = vmul.f32 0.125, %v338_v19  ;;  %v371_v20 = vmul.f32 0.125, %v341_v30 }
 0x13e   : > { %v1539_v22 = vpop.eup %1538  ;;  %1550 = vrsqrt.f32 %v385_v26 }
 0x13f   : > { %v411_v31 = vmul.f32 %v1539_v22, %v1815_v36  ;;  %v386_v39 = vadd.f32 1e-05, %v370_v27  ;;  %v387_v24 = vadd.f32 1e-05, %v371_v20 }
 0x140   : > { %v344_v40 = vpop.xlane.xlu1 %343  ;;  %v347_v49 = vpop.xlane.xlu0 %346 }
 0x141   : > { %v433_v33 = vmul.f32 %v1915_v16, %v411_v31  ;;  %v372_v48 = vmul.f32 0.125, %v344_v40  ;;  %1552 = vrsqrt.f32 %v386_v39  ;;  %v373_v28 = vmul.f32 0.125, %v347_v49 }
 0x142   : > { %v1541_v34 = vpop.eup %1540  ;;  %1554 = vrsqrt.f32 %v387_v24 }
 0x143   : > { %v1543_v38 = vpop.eup %1542  ;;  %v1925_v41 = vadd.f32 %v1921_v32, %v433_v33  ;;  %v412_v42 = vmul.f32 %v1541_v34, %v1823_v44  ;;  %v388_v52 = vadd.f32 1e-05, %v372_v48 }
 0x144   : > { %v413_v36 = vmul.f32 %v1543_v38, %v1817_v37  ;;  %v350_v59 = vpop.xlane.xlu1 %349  ;;  %v353_v61 = vpop.xlane.xlu0 %352 }
 0x145   : > { %1504 = vmatmul.mubr.msk.f32.vlgmr.msra.gmra.mxu0 %vm217_vm0, %v1925_v41  ;;  %v434_v43 = vmul.f32 %v1915_v16, %v412_v42  ;;  %1556 = vrsqrt.f32 %v388_v52  ;;  %v374_v60 = vmul.f32 0.125, %v350_v59 }
 0x146   : > { %v1545_v46 = vpop.eup %1544  ;;  %591 = vmatprep.mubr.f32.mxu0 %v1706_v56  ;;  %v435_v51 = vmul.f32 %v1915_v16, %v413_v36 }
 0x147   : > { %v1934_v50 = vadd.f32 %v1921_v32, %v434_v43  ;;  %v414_v44 = vmul.f32 %v1545_v46, %v1825_v45  ;;  %v1547_v37 = vpop.eup %1546  ;;  %v389_v45 = vadd.f32 1e-05, %v373_v28  ;;  %v390_v4 = vadd.f32 1e-05, %v374_v60 }
 0x148   : > { %v1942_v29 = vadd.f32 %v1921_v32, %v435_v51  ;;  %v415_v57 = vmul.f32 %v1547_v37, %v1833_v54  ;;  %v375_v54 = vmul.f32 0.125, %v353_v61  ;;  %v356_v5 = vpop.xlane.xlu1 %355  ;;  %v359_v13 = vpop.xlane.xlu0 %358 }
 0x149   : > { %1505 = vmatmul.mubr.msk.f32.gmra.mxu0 %vm217_vm0, %v1934_v50  ;;  %v436_v53 = vmul.f32 %v1915_v16, %v414_v44  ;;  %1558 = vrsqrt.f32 %v389_v45  ;;  %v376_v12 = vmul.f32 0.125, %v356_v5  ;;  %v377_v22 = vmul.f32 0.125, %v359_v13 }
 0x14a   : > { %597 = vmatprep.mubr.f32.mxu0 %v1706_v56  ;;  %v1549_v58 = vpop.eup %1548  ;;  %v437_v63 = vmul.f32 %v1915_v16, %v415_v57  ;;  %1560 = vrsqrt.f32 %v390_v4 }
 0x14b   : > { %v1950_v62 = vadd.f32 %v1921_v32, %v436_v53  ;;  %v416_v2 = vmul.f32 %v1549_v58, %v1835_v55  ;;  %v1551_v3 = vpop.eup %1550  ;;  %v391_v55 = vadd.f32 1e-05, %v375_v54 }
 0x14c   : > { %v1958_v6 = vadd.f32 %v1921_v32, %v437_v63  ;;  %v417_v8 = vmul.f32 %v1551_v3, %v1844_v0  ;;  %v392_v0 = vadd.f32 1e-05, %v376_v12  ;;  %v362_v33 = vpop.xlane.xlu1 %361 }
 0x14d   : > { %1506 = vmatmul.mubr.msk.f32.gmra.mxu0 %vm217_vm0, %v1942_v29  ;;  %v438_v7 = vmul.f32 %v1915_v16, %v416_v2  ;;  %1562 = vrsqrt.f32 %v391_v55  ;;  %v378_v20 = vmul.f32 0.125, %v362_v33 }
 0x14e   : > { %603 = vmatprep.mubr.f32.mxu0 %v1706_v56  ;;  %v1553_v9 = vpop.eup %1552  ;;  %v439_v15 = vmul.f32 %v1915_v16, %v417_v8  ;;  %1564 = vrsqrt.f32 %v392_v0 }
 0x14f   : > { %v1966_v14 = vadd.f32 %v1921_v32, %v438_v7  ;;  %v418_v18 = vmul.f32 %v1553_v9, %v1847_v1  ;;  %v1555_v19 = vpop.eup %1554  ;;  %v393_v1 = vadd.f32 1e-05, %v377_v22 }
 0x150   : > { %v1974_v27 = vadd.f32 %v1921_v32, %v439_v15  ;;  %v419_v31 = vmul.f32 %v1555_v19, %v1856_v10  ;;  %v394_v10 = vadd.f32 1e-05, %v378_v20 }
 0x151   : > { %1507 = vmatmul.mubr.msk.f32.gmra.mxu0 %vm217_vm0, %v1950_v62  ;;  %v440_v30 = vmul.f32 %v1915_v16, %v418_v18  ;;  %1566 = vrsqrt.f32 %v393_v1 }
 0x152   : > { %609 = vmatprep.mubr.f32.mxu0 %v1706_v56  ;;  %v1557_v26 = vpop.eup %1556  ;;  %v441_v39 = vmul.f32 %v1915_v16, %v419_v31  ;;  %1568 = vrsqrt.f32 %v394_v10 }
 0x153   : > { %v1982_v38 = vadd.f32 %v1921_v32, %v440_v30  ;;  %v420_v40 = vmul.f32 %v1557_v26, %v1859_v11 }
 0x154   : > { %v1990_v42 = vadd.f32 %v1921_v32, %v441_v39 }
 0x155   : > { %1508 = vmatmul.mubr.msk.f32.gmra.mxu0 %vm217_vm0, %v1958_v6  ;;  %v442_v36 = vmul.f32 %v1915_v16, %v420_v40 }
 0x156   : > { %615 = vmatprep.mubr.f32.mxu0 %v1706_v56  ;;  %v1559_v34 = vpop.eup %1558 }
 0x157   : > { %v421_v43 = vmul.f32 %v1559_v34, %v1868_v23  ;;  %v1561_v46 = vpop.eup %1560  ;;  %v1998_v11 = vadd.f32 %v1921_v32, %v442_v36 }
 0x158   : > { %v422_v48 = vmul.f32 %v1561_v46, %v1871_v17 }
 0x159   : > { %1509 = vmatmul.mubr.msk.f32.gmra.mxu0 %vm217_vm0, %v1966_v14  ;;  %v443_v24 = vmul.f32 %v1915_v16, %v421_v43 }
 0x15a   : > { %621 = vmatprep.mubr.f32.mxu0 %v1706_v56  ;;  %v1563_v49 = vpop.eup %1562  ;;  %v444_v44 = vmul.f32 %v1915_v16, %v422_v48 }
 0x15b   : > { %v1565_v23 = vpop.eup %1564  ;;  %v2006_v51 = vadd.f32 %v1921_v32, %v443_v24  ;;  %v423_v37 = vmul.f32 %v1563_v49, %v1880_v35 }
 0x15c   : > { %v2014_v52 = vadd.f32 %v1921_v32, %v444_v44  ;;  %v424_v53 = vmul.f32 %v1565_v23, %v1883_v21 }
 0x15d   : > { %1510 = vmatmul.mubr.msk.f32.gmra.mxu0 %vm217_vm0, %v1974_v27  ;;  %v445_v28 = vmul.f32 %v1915_v16, %v423_v37 }
 0x15e   : > { %627 = vmatprep.mubr.f32.mxu0 %v1706_v56  ;;  %v1567_v17 = vpop.eup %1566  ;;  %v446_v57 = vmul.f32 %v1915_v16, %v424_v53 }
 0x15f   : > { %v2022_v35 = vadd.f32 %v1921_v32, %v445_v28  ;;  %v425_v58 = vmul.f32 %v1567_v17, %v1892_v47  ;;  %v1569_v59 = vpop.eup %1568 }
 0x160   : > { %v2030_v21 = vadd.f32 %v1921_v32, %v446_v57  ;;  %v426_v60 = vmul.f32 %v1569_v59, %v1895_v25 }
 0x161   : > { %1511 = vmatmul.mubr.msk.f32.gmra.mxu0 %vm217_vm0, %v1982_v38  ;;  %v447_v45 = vmul.f32 %v1915_v16, %v425_v58 }
 0x162   : > { %633 = vmatprep.mubr.f32.mxu0 %v1706_v56  ;;  %v448_v61 = vmul.f32 %v1915_v16, %v426_v60 }
 0x163   : > { %v2038_v47 = vadd.f32 %v1921_v32, %v447_v45 }
 0x164   : > { %v2045_v63 = vadd.f32 %v1921_v32, %v448_v61 }
 0x165   : > { %1512 = vmatmul.mubr.msk.f32.gmra.mxu0 %vm217_vm0, %v1990_v42  ;;  %v696_v60 = vmul.f32 %v2038_v47, %v2038_v47 }
 0x166   : > { %639 = vmatprep.mubr.f32.mxu0 %v1706_v56 }
 0x169   : > { %1513 = vmatmul.mubr.msk.f32.gmra.mxu0 %vm217_vm0, %v1998_v11 }
 0x16a   : > { %645 = vmatprep.mubr.f32.mxu0 %v1706_v56 }
 0x16d   : > { %1514 = vmatmul.mubr.msk.f32.gmra.mxu0 %vm217_vm0, %v2006_v51 }
 0x16e   : > { %651 = vmatprep.mubr.f32.mxu0 %v1706_v56 }
 0x171   : > { %1515 = vmatmul.mubr.msk.f32.gmra.mxu0 %vm217_vm0, %v2014_v52 }
 0x172   : > { %657 = vmatprep.mubr.f32.mxu0 %v1706_v56 }
 0x175   : > { %1516 = vmatmul.mubr.msk.f32.gmra.mxu0 %vm217_vm0, %v2022_v35 }
 0x176   : > { %663 = vmatprep.mubr.f32.mxu0 %v1706_v56 }
 0x179   : > { %1517 = vmatmul.mubr.msk.f32.gmra.mxu0 %vm217_vm0, %v2030_v21 }
 0x17a   : > { %669 = vmatprep.mubr.f32.mxu0 %v1706_v56 }
 0x17d   : > { %1518 = vmatmul.mubr.msk.f32.gmra.mxu0 %vm217_vm0, %v2038_v47 }
 0x17e   : > { %675 = vmatprep.mubr.f32.mxu0 %v1706_v56 }
 0x181   : > { %1519 = vmatmul.mubr.msk.f32.gmra.mxu0 %vm217_vm0, %v2045_v63 }
 0x205   : > { %v2049_v25 = vpop.f32.mrf.mxu0 }
 0x207   : > { %v2051_v2 = vpop.f32.mrf.mxu0 }
 0x208   : > { %v762_v3 = vmax.f32 %v2049_v25, %v2051_v2 }
 0x209   : > { %v2055_v54 = vpop.f32.mrf.mxu0 }
 0x20a   : > { %2674 = vst [vmem:[#allocation2_spill] sm:$0xff] %v2055_v54  ;;  %763 = vmax.xlane.f32.xlu0 %v762_v3 }
 0x20b   : > { %v2057_v16 = vpop.f32.mrf.mxu0 }
 0x20c   : > { %2675 = vst [vmem:[#allocation3_spill] sm:$0xff] %v2057_v16  ;;  %v765_v56 = vmax.f32 %v2055_v54, %v2057_v16 }
 0x20d   : > { %v2061_v32 = vpop.f32.mrf.mxu0 }
 0x20e   : > { %766 = vmax.xlane.f32.xlu1 %v765_v56  ;;  %v740_v56 = vsel %vm217_vm0, %v696_v60, 0.0  ;;  %v691_v60 = vmul.f32 %v1998_v11, %v1998_v11 }
 0x20f   : > { %v2063_v4 = vpop.f32.mrf.mxu0 }
 0x210   : > { %v768_v5 = vmax.f32 %v2061_v32, %v2063_v4 }
 0x211   : > { %v2067_v7 = vpop.f32.mrf.mxu0 }
 0x212   : > { %769 = vmax.xlane.f32.xlu0 %v768_v5  ;;  %v694_v5 = vmul.f32 %v2022_v35, %v2022_v35 }
 0x213   : > { %v2069_v8 = vpop.f32.mrf.mxu0 }
 0x214   : > { %v771_v9 = vmax.f32 %v2067_v7, %v2069_v8 }
 0x215   : > { %v2073_v55 = vpop.f32.mrf.mxu0 }
 0x216   : > { %772 = vmax.xlane.f32.xlu1 %v771_v9  ;;  %v697_v9 = vmul.f32 %v2045_v63, %v2045_v63 }
 0x217   : > { %v2075_v12 = vpop.f32.mrf.mxu0 }
 0x218   : > { %v774_v13 = vmax.f32 %v2073_v55, %v2075_v12 }
 0x219   : > { %v2079_v15 = vpop.f32.mrf.mxu0 }
 0x21a   : > { %775 = vmax.xlane.f32.xlu0 %v774_v13  ;;  %v734_v13 = vsel %vm217_vm0, %v694_v5, 0.0  ;;  %v686_v5 = vmul.f32 %v1958_v6, %v1958_v6 }
 0x21b   : > { %v2081_v18 = vpop.f32.mrf.mxu0 }
 0x21c   : > { %v777_v19 = vmax.f32 %v2079_v15, %v2081_v18 }
 0x21d   : > { %v2085_v0 = vpop.f32.mrf.mxu0 }
 0x21e   : > { %778 = vmax.xlane.f32.xlu1 %v777_v19  ;;  %v743_v19 = vsel %vm217_vm0, %v697_v9, 0.0  ;;  %v689_v9 = vmul.f32 %v1982_v38, %v1982_v38 }
 0x21f   : > { %v2087_v22 = vpop.f32.mrf.mxu0 }
 0x220   : > { %v780_v26 = vmax.f32 %v2085_v0, %v2087_v22 }
 0x221   : > { %v2091_v30 = vpop.f32.mrf.mxu0 }
 0x222   : > { %781 = vmax.xlane.f32.xlu0 %v780_v26  ;;  %v692_v26 = vmul.f32 %v2006_v51, %v2006_v51 }
 0x223   : > { %v2093_v31 = vpop.f32.mrf.mxu0 }
 0x224   : > { %v783_v33 = vmax.f32 %v2091_v30, %v2093_v31 }
 0x225   : > { %v2097_v1 = vpop.f32.mrf.mxu0 }
 0x226   : > { %784 = vmax.xlane.f32.xlu1 %v783_v33  ;;  %v695_v33 = vmul.f32 %v2030_v21, %v2030_v21 }
 0x227   : > { %v2099_v34 = vpop.f32.mrf.mxu0 }
 0x228   : > { %v786_v20 = vmax.f32 %v2097_v1, %v2099_v34 }
 0x229   : > { %v2103_v39 = vpop.f32.mrf.mxu0 }
 0x22a   : > { %787 = vmax.xlane.f32.xlu0 %v786_v20  ;;  %v728_v20 = vsel %vm217_vm0, %v692_v26, 0.0  ;;  %v684_v26 = vmul.f32 %v1942_v29, %v1942_v29 }
 0x22b   : > { %v2105_v40 = vpop.f32.mrf.mxu0 }
 0x22c   : > { %v789_v10 = vmax.f32 %v2103_v39, %v2105_v40 }
 0x22d   : > { %v2109_v36 = vpop.f32.mrf.mxu0 }
 0x22e   : > { %790 = vmax.xlane.f32.xlu1 %v789_v10  ;;  %v737_v10 = vsel %vm217_vm0, %v695_v33, 0.0  ;;  %v687_v33 = vmul.f32 %v1966_v14, %v1966_v14 }
 0x22f   : > { %v2111_v43 = vpop.f32.mrf.mxu0 }
 0x230   : > { %v792_v46 = vmax.f32 %v2109_v36, %v2111_v43 }
 0x231   : > { %v2115_v24 = vpop.f32.mrf.mxu0 }
 0x232   : > { %793 = vmax.xlane.f32.xlu0 %v792_v46  ;;  %v690_v46 = vmul.f32 %v1990_v42, %v1990_v42 }
 0x233   : > { %v2117_v48 = vpop.f32.mrf.mxu0 }
 0x234   : > { %v795_v49 = vmax.f32 %v2115_v24, %v2117_v48 }
 0x235   : > { %v2121_v23 = vpop.f32.mrf.mxu0 }
 0x236   : > { %796 = vmax.xlane.f32.xlu1 %v795_v49  ;;  %v693_v49 = vmul.f32 %v2014_v52, %v2014_v52 }
 0x237   : > { %v2123_v44 = vpop.f32.mrf.mxu0 }
 0x238   : > { %v798_v37 = vmax.f32 %v2121_v23, %v2123_v44 }
 0x239   : > { %v2127_v17 = vpop.f32.mrf.mxu0 }
 0x23a   : > { %799 = vmax.xlane.f32.xlu0 %v798_v37  ;;  %v722_v37 = vsel %vm217_vm0, %v690_v46, 0.0  ;;  %v682_v46 = vmul.f32 %v1925_v41, %v1925_v41 }
 0x23b   : > { %v2129_v28 = vpop.f32.mrf.mxu0 }
 0x23c   : > { %v801_v53 = vmax.f32 %v2127_v17, %v2129_v28 }
 0x23d   : > { %v2133_v57 = vpop.f32.mrf.mxu0 }
 0x23e   : > { %802 = vmax.xlane.f32.xlu1 %v801_v53  ;;  %v731_v53 = vsel %vm217_vm0, %v693_v49, 0.0  ;;  %v685_v49 = vmul.f32 %v1950_v62, %v1950_v62 }
 0x23f   : > { %v2135_v58 = vpop.f32.mrf.mxu0 }
 0x240   : > { %v804_v59 = vmax.f32 %v2133_v57, %v2135_v58 }
 0x241   : > { %v2139_v45 = vpop.f32.mrf.mxu0 }
 0x242   : > { %805 = vmax.xlane.f32.xlu0 %v804_v59  ;;  %v688_v59 = vmul.f32 %v1974_v27, %v1974_v27 }
 0x243   : > { %v2143_v61 = vpop.f32.mrf.mxu0 }
 0x244   : > { %v807_v3 = vmax.f32 %v2139_v45, %v2143_v61 }
 0x246   : > { %741 = vadd.xlane.f32.xlu0 %v740_v56  ;;  %808 = vmax.xlane.f32.xlu1 %v807_v3  ;;  %v716_v3 = vsel %vm217_vm0, %v688_v59, 0.0  ;;  %v725_v56 = vsel %vm217_vm0, %v691_v60, 0.0  ;;  %v683_v59 = vmul.f32 %v1934_v50, %v1934_v50 }
 0x248   : > { %v701_v60 = vsel %vm217_vm0, %v683_v59, 0.0 }
 0x24a   : > { %735 = vadd.xlane.f32.xlu0 %v734_v13  ;;  %744 = vadd.xlane.f32.xlu1 %v743_v19  ;;  %v710_v13 = vsel %vm217_vm0, %v686_v5, 0.0  ;;  %v719_v19 = vsel %vm217_vm0, %v689_v9, 0.0 }
 0x24e   : > { %729 = vadd.xlane.f32.xlu0 %v728_v20  ;;  %738 = vadd.xlane.f32.xlu1 %v737_v10  ;;  %v704_v20 = vsel %vm217_vm0, %v684_v26, 0.0  ;;  %v713_v10 = vsel %vm217_vm0, %v687_v33, 0.0 }
 0x252   : > { %723 = vadd.xlane.f32.xlu0 %v722_v37  ;;  %732 = vadd.xlane.f32.xlu1 %v731_v53  ;;  %v698_v37 = vsel %vm217_vm0, %v682_v46, 0.0  ;;  %v707_v53 = vsel %vm217_vm0, %v685_v49, 0.0 }
 0x256   : > { %717 = vadd.xlane.f32.xlu0 %v716_v3  ;;  %726 = vadd.xlane.f32.xlu1 %v725_v56  ;;  %v1707_v56 = vmov 0  }
 0x257   : > { %1200 = vmatprep.mubr.bf16.mxu0 %v1707_v56 }
 0x25a   : > { %711 = vadd.xlane.f32.xlu0 %v710_v13  ;;  %720 = vadd.xlane.f32.xlu1 %v719_v19 }
 0x25e   : > { %705 = vadd.xlane.f32.xlu0 %v704_v20  ;;  %714 = vadd.xlane.f32.xlu1 %v713_v10 }
 0x262   : > { %699 = vadd.xlane.f32.xlu0 %v698_v37  ;;  %708 = vadd.xlane.f32.xlu1 %v707_v53 }
 0x266   : > { %702 = vadd.xlane.f32.xlu1 %v701_v60 }
 0x28f   : > { %1103 = vxpose.xlu0.b32.start [1/16] (narrow) %v1925_v41, 8 }
 0x293   : > { %1104 = vxpose.xlu0.b32.cont [2/16] (narrow) %v1934_v50, 8  ;;  %v2201_v3 = vpop.xlane.xlu0 %763 }
 0x294   : > { %2676 = vst [vmem:[#allocation4_spill] sm:$0xff] %v2201_v3 }
 0x297   : > { %1105 = vxpose.xlu0.b32.cont [3/16] (narrow) %v1942_v29, 8  ;;  %v2204_v41 = vpop.xlane.xlu1 %766 }
 0x298   : > { %2677 = vst [vmem:[#allocation5_spill] sm:$0xff] %v2204_v41 }
 0x29b   : > { %1106 = vxpose.xlu0.b32.cont [4/16] (narrow) %v1950_v62, 8  ;;  %v2206_v50 = vpop.xlane.xlu0 %769 }
 0x29f   : > { %1107 = vxpose.xlu0.b32.cont [5/16] (narrow) %v1958_v6, 8  ;;  %v2209_v29 = vpop.xlane.xlu1 %772 }
 0x2a3   : > { %1108 = vxpose.xlu0.b32.cont [6/16] (narrow) %v1966_v14, 8  ;;  %v2211_v62 = vpop.xlane.xlu0 %775 }
 0x2a4   : > { %v810_v13 = vmax.f32 %v2201_v3, %v2211_v62 }
 0x2a7   : > { %1109 = vxpose.xlu0.b32.cont [7/16] (narrow) %v1974_v27, 8  ;;  %v2214_v6 = vpop.xlane.xlu1 %778 }
 0x2ab   : > { %1110 = vxpose.xlu0.b32.cont [8/16] (narrow) %v1982_v38, 8  ;;  %v2216_v14 = vpop.xlane.xlu0 %781 }
 0x2af   : > { %1111 = vxpose.xlu0.b32.cont [9/16] (narrow) %v1990_v42, 8  ;;  %v2219_v27 = vpop.xlane.xlu1 %784 }
 0x2b0   : > { %v813_v19 = vmax.f32 %v2209_v29, %v2219_v27 }
 0x2b3   : > { %1112 = vxpose.xlu0.b32.cont [10/16] (narrow) %v1998_v11, 8  ;;  %v2221_v38 = vpop.xlane.xlu0 %787 }
 0x2b4   : > { %v814_v26 = vmax.f32 %v810_v13, %v2221_v38 }
 0x2b7   : > { %1113 = vxpose.xlu0.b32.cont [11/16] (narrow) %v2006_v51, 8  ;;  %v2224_v42 = vpop.xlane.xlu1 %790 }
 0x2bb   : > { %1114 = vxpose.xlu0.b32.cont [12/16] (narrow) %v2014_v52, 8  ;;  %v2226_v11 = vpop.xlane.xlu0 %793  ;;  %v811_v52 = vmax.f32 %v2204_v41, %v2214_v6 }
 0x2bf   : > { %1115 = vxpose.xlu0.b32.cont [13/16] (narrow) %v2022_v35, 8  ;;  %v2229_v5 = vpop.xlane.xlu1 %796 }
 0x2c0   : > { %v817_v20 = vmax.f32 %v813_v19, %v2229_v5 }
 0x2c3   : > { %1116 = vxpose.xlu0.b32.cont [14/16] (narrow) %v2030_v21, 8  ;;  %v2231_v51 = vpop.xlane.xlu0 %799  ;;  %v812_v21 = vmax.f32 %v2206_v50, %v2216_v14 }
 0x2c4   : > { %v818_v49 = vmax.f32 %v814_v26, %v2231_v51 }
 0x2c5   : > { %v816_v33 = vmax.f32 %v812_v21, %v2226_v11 }
 0x2c7   : > { %1117 = vxpose.xlu0.b32.cont [15/16] (narrow) %v2038_v47, 8  ;;  %v2236_v9 = vpop.xlane.xlu1 %802  ;;  %v815_v47 = vmax.f32 %v811_v52, %v2224_v42 }
 0x2cb   : > { %1118 = vxpose.xlu0.b32.end [16/16] (narrow) %v2045_v63, 8  ;;  %v2239_v35 = vpop.xlane.xlu0 %805  ;;  %v819_v63 = vmax.f32 %v815_v47, %v2236_v9 }
 0x2cc   : > { %v820_v37 = vmax.f32 %v816_v33, %v2239_v35 }
 0x2cd   : > { %v822_v60 = vmax.f32 %v818_v49, %v819_v63 }
 0x2cf   : > { %v2252_v10 = vpop.xlane.xlu1 %808  ;;  %v742_v46 = vpop.xlane.xlu0 %741 }
 0x2d0   : > { %v821_v53 = vmax.f32 %v817_v20, %v2252_v10  ;;  %v760_v59 = vmul.f32 0.17677669, %v742_v46 }
 0x2d2   : > { %v823_v56 = vmax.f32 %v820_v37, %v821_v53  ;;  %v859_v52 = vsub.f32 %v2133_v57, %v760_v59  ;;  %v860_v13 = vsub.f32 %v2135_v58, %v760_v59 }
 0x2d3   : > { %v745_v21 = vpop.xlane.xlu1 %744  ;;  %v736_v19 = vpop.xlane.xlu0 %735 }
 0x2d4   : > { %v824_v41 = vmax.f32 %v822_v60, %v823_v56  ;;  %v891_v47 = vsub.f32 %v859_v52, %v2239_v35  ;;  %v892_v16 = vsub.f32 %v860_v13, %v2239_v35  ;;  %v761_v54 = vmul.f32 0.17677669, %v745_v21 }
 0x2d5   : > { %v758_v26 = vmul.f32 0.17677669, %v736_v19 }
 0x2d6   : > { %v825_v3 = vrot.slane %v824_v41, 4  ;;  %v951_v33 = vmul.f32 1.442695, %v891_v47  ;;  %v861_v20 = vsub.f32 %v2139_v45, %v761_v54  ;;  %v953_v46 = vmul.f32 1.442695, %v892_v16 }
 0x2d7   : > { %v862_v63 = vsub.f32 %v2143_v61, %v761_v54  ;;  %v855_v57 = vsub.f32 %v2121_v23, %v758_v26  ;;  %v856_v58 = vsub.f32 %v2123_v44, %v758_v26  ;;  %v739_v49 = vpop.xlane.xlu1 %738  ;;  %v730_v37 = vpop.xlane.xlu0 %729 }
 0x2d8   : > { %v826_v53 = vmax.f32 %v824_v41, %v825_v3  ;;  %v893_v59 = vsub.f32 %v861_v20, %v2252_v10  ;;  %v759_v60 = vmul.f32 0.17677669, %v739_v49  ;;  %1570 = vpow2.f32 %v951_v33 }
 0x2d9   : > { %v894_v56 = vsub.f32 %v862_v63, %v2252_v10  ;;  %v887_v52 = vsub.f32 %v855_v57, %v2231_v51  ;;  %v888_v45 = vsub.f32 %v856_v58, %v2231_v51  ;;  %1572 = vpow2.f32 %v953_v46 }
 0x2da   : > { %v827_v16 = vrot.slane %v826_v53, 2  ;;  %v955_v13 = vmul.f32 1.442695, %v893_v59  ;;  %v857_v54 = vsub.f32 %v2127_v17, %v759_v60  ;;  %v858_v23 = vsub.f32 %v2129_v28, %v759_v60 }
 0x2db   : > { %v957_v44 = vmul.f32 1.442695, %v894_v56  ;;  %v943_v61 = vmul.f32 1.442695, %v887_v52  ;;  %v945_v3 = vmul.f32 1.442695, %v888_v45  ;;  %v733_v41 = vpop.xlane.xlu1 %732  ;;  %v724_v21 = vpop.xlane.xlu0 %723 }
 0x2dc   : > { %v828_v19 = vmax.f32 %v826_v53, %v827_v16  ;;  %1574 = vpow2.f32 %v955_v13  ;;  %v889_v47 = vsub.f32 %v857_v54, %v2236_v9  ;;  %v890_v26 = vsub.f32 %v858_v23, %v2236_v9 }
 0x2dd   : > { %1576 = vpow2.f32 %v957_v44  ;;  %v756_v33 = vmul.f32 0.17677669, %v730_v37  ;;  %v757_v20 = vmul.f32 0.17677669, %v733_v41  ;;  %v754_v63 = vmul.f32 0.17677669, %v724_v21 }
 0x2de   : > { %v829_v57 = vrot.slane %v828_v19, 1  ;;  %1578 = vpow2.f32 %v943_v61  ;;  %v947_v17 = vmul.f32 1.442695, %v889_v47  ;;  %v949_v28 = vmul.f32 1.442695, %v890_v26 }
 0x2df   : > { %v851_v46 = vsub.f32 %v2109_v36, %v756_v33  ;;  %v852_v58 = vsub.f32 %v2111_v43, %v756_v33  ;;  %v853_v49 = vsub.f32 %v2115_v24, %v757_v20  ;;  %v727_v53 = vpop.xlane.xlu1 %726  ;;  %v718_v59 = vpop.xlane.xlu0 %717  ;;  %1580 = vpow2.f32 %v945_v3 }
 0x2e0   : > { %v2276_v60 = vmax.f32 %v828_v19, %v829_v57  ;;  %v854_v56 = vsub.f32 %v2117_v48, %v757_v20  ;;  %v847_v37 = vsub.f32 %v2097_v1, %v754_v63  ;;  %1582 = vpow2.f32 %v947_v17 }
 0x2e1   : > { %v883_v52 = vsub.f32 %v851_v46, %v2226_v11  ;;  %v884_v45 = vsub.f32 %v852_v58, %v2226_v11  ;;  %v885_v36 = vsub.f32 %v853_v49, %v2229_v5  ;;  %v848_v16 = vsub.f32 %v2099_v34, %v754_v63 }
 0x2e2   : > { %v1006_v43 = vsub.f32 %v2252_v10, %v2276_v60  ;;  %v886_v24 = vsub.f32 %v854_v56, %v2229_v5  ;;  %v879_v13 = vsub.f32 %v847_v37, %v2221_v38  ;;  %1584 = vpow2.f32 %v949_v28 }
 0x2e3   : > { %v935_v48 = vmul.f32 1.442695, %v883_v52  ;;  %v937_v54 = vmul.f32 1.442695, %v884_v45  ;;  %v939_v1 = vmul.f32 1.442695, %v885_v36  ;;  %v721_v23 = vpop.xlane.xlu1 %720  ;;  %v712_v44 = vpop.xlane.xlu0 %711  ;;  %v880_v41 = vsub.f32 %v848_v16, %v2221_v38 }
 0x2e4   : > { %v1037_v61 = vmul.f32 1.442695, %v1006_v43  ;;  %v941_v3 = vmul.f32 1.442695, %v886_v24  ;;  %v1005_v21 = vsub.f32 %v2239_v35, %v2276_v60  ;;  %v755_v10 = vmul.f32 0.17677669, %v727_v53 }
 0x2e5   : > { %1586 = vpow2.f32 %v935_v48  ;;  %v752_v19 = vmul.f32 0.17677669, %v718_v59  ;;  %v753_v47 = vmul.f32 0.17677669, %v721_v23  ;;  %v2291_v34 = vpop.eup %1570  ;;  %v927_v26 = vmul.f32 1.442695, %v879_v13 }
 0x2e6   : > { %1588 = vpow2.f32 %v1037_v61  ;;  %v929_v33 = vmul.f32 1.442695, %v880_v41  ;;  %v750_v20 = vmul.f32 0.17677669, %v712_v44  ;;  %v849_v63 = vsub.f32 %v2103_v39, %v755_v10  ;;  %v2296_v58 = vpop.eup %1572 }
 0x2e7   : > { %1590 = vpow2.f32 %v937_v54  ;;  %v850_v57 = vsub.f32 %v2105_v40, %v755_v10  ;;  %v843_v17 = vsub.f32 %v2085_v0, %v752_v19  ;;  %v715_v28 = vpop.xlane.xlu1 %714  ;;  %v706_v46 = vpop.xlane.xlu0 %705  ;;  %v844_v49 = vsub.f32 %v2087_v22, %v752_v19 }
 0x2e8   : > { %1592 = vpow2.f32 %v939_v1  ;;  %v845_v53 = vsub.f32 %v2091_v30, %v753_v47  ;;  %v846_v59 = vsub.f32 %v2093_v31, %v753_v47  ;;  %v881_v39 = vsub.f32 %v849_v63, %v2224_v42 }
 0x2e9   : > { %v2301_v56 = vpop.eup %1574  ;;  %1594 = vpow2.f32 %v941_v3  ;;  %v882_v40 = vsub.f32 %v850_v57, %v2224_v42  ;;  %v875_v0 = vsub.f32 %v843_v17, %v2216_v14  ;;  %v876_v52 = vsub.f32 %v844_v49, %v2216_v14 }
 0x2ea   : > { %v2306_v37 = vpop.eup %1576  ;;  %1596 = vpow2.f32 %v927_v26  ;;  %v877_v22 = vsub.f32 %v845_v53, %v2219_v27  ;;  %v878_v30 = vsub.f32 %v846_v59, %v2219_v27  ;;  %v931_v31 = vmul.f32 1.442695, %v881_v39 }
 0x2eb   : > { %v2311_v45 = vpop.eup %1578  ;;  %1598 = vpow2.f32 %v929_v33  ;;  %v933_v36 = vmul.f32 1.442695, %v882_v40  ;;  %v919_v43 = vmul.f32 1.442695, %v875_v0  ;;  %v709_v24 = vpop.xlane.xlu1 %708  ;;  %v921_v13 = vmul.f32 1.442695, %v876_v52 }
 0x2ec   : > { %v700_v16 = vpop.xlane.xlu0 %699  ;;  %v923_v48 = vmul.f32 1.442695, %v877_v22  ;;  %v925_v54 = vmul.f32 1.442695, %v878_v30  ;;  %v839_v1 = vsub.f32 %v2073_v55, %v750_v20  ;;  %v2314_v23 = vpop.eup %1580  ;;  %1600 = vpow2.f32 %v931_v31 }
 0x2ed   : > { %v840_v44 = vsub.f32 %v2075_v12, %v750_v20  ;;  %v751_v61 = vmul.f32 0.17677669, %v715_v28  ;;  %v748_v3 = vmul.f32 0.17677669, %v706_v46  ;;  %v2317_v41 = vpop.eup %1582  ;;  %1602 = vpow2.f32 %v933_v36 }
 0x2ee   : > { %v871_v10 = vsub.f32 %v839_v1, %v2211_v62  ;;  %v749_v19 = vmul.f32 0.17677669, %v709_v24  ;;  %v746_v47 = vmul.f32 0.17677669, %v700_v16  ;;  %1604 = vpow2.f32 %v919_v43 }
 0x2ef   : > { %v872_v26 = vsub.f32 %v840_v44, %v2211_v62  ;;  %v841_v33 = vsub.f32 %v2079_v15, %v751_v61  ;;  %v842_v55 = vsub.f32 %v2081_v18, %v751_v61  ;;  %v2323_v63 = vpop.eup %1584  ;;  %1606 = vpow2.f32 %v921_v13  ;;  %v703_v40 = vpop.xlane.xlu1 %702 }
 0x2f0   : > { %v911_v12 = vmul.f32 1.442695, %v871_v10  ;;  %v835_v20 = vsub.f32 %v2061_v32, %v748_v3  ;;  %v836_v57 = vsub.f32 %v2063_v4, %v748_v3  ;;  %1608 = vpow2.f32 %v923_v48  ;;  %v2679_v3 = vld [vmem:[#allocation2_spill] sm:$0xff]  ;;  %v2680_v10 = vld [vmem:[#allocation3_spill] sm:$0xff] }
 0x2f1   : > { %v913_v17 = vmul.f32 1.442695, %v872_v26  ;;  %v873_v28 = vsub.f32 %v841_v33, %v2214_v6  ;;  %v874_v46 = vsub.f32 %v842_v55, %v2214_v6  ;;  %1610 = vpow2.f32 %v925_v54  ;;  %v2678_v54 = vld [vmem:[#allocation4_spill] sm:$0xff]  ;;  %v2681_v55 = vld [vmem:[#allocation5_spill] sm:$0xff] }
 0x2f2   : > { %v2329_v49 = vpop.eup %1586  ;;  %v867_v15 = vsub.f32 %v835_v20, %v2206_v50  ;;  %v868_v18 = vsub.f32 %v836_v57, %v2206_v50  ;;  %v837_v53 = vsub.f32 %v2067_v7, %v749_v19  ;;  %1612 = vpow2.f32 %v911_v12 }
 0x2f3   : > { %v2334_v59 = vpop.eup %1588  ;;  %v915_v32 = vmul.f32 1.442695, %v873_v28  ;;  %v917_v4 = vmul.f32 1.442695, %v874_v46  ;;  %v838_v39 = vsub.f32 %v2069_v8, %v749_v19  ;;  %1614 = vpow2.f32 %v913_v17 }
 0x2f4   : > { %v2337_v0 = vpop.eup %1590  ;;  %v903_v52 = vmul.f32 1.442695, %v867_v15  ;;  %v905_v22 = vmul.f32 1.442695, %v868_v18  ;;  %v869_v30 = vsub.f32 %v837_v53, %v2209_v29  ;;  %v831_v36 = vsub.f32 %v2049_v25, %v746_v47 }
 0x2f5   : > { %v2340_v31 = vpop.eup %1592  ;;  %1616 = vpow2.f32 %v915_v32  ;;  %v870_v7 = vsub.f32 %v838_v39, %v2209_v29  ;;  %v832_v43 = vsub.f32 %v2051_v2, %v746_v47  ;;  %v747_v16 = vmul.f32 0.17677669, %v703_v40 }
 0x2f6   : > { %v2345_v24 = vpop.eup %1594  ;;  %1618 = vpow2.f32 %v917_v4  ;;  %v907_v8 = vmul.f32 1.442695, %v869_v30  ;;  %v863_v1 = vsub.f32 %v831_v36, %v2678_v54  ;;  %v1035_v26 = vmul.f32 1.442695, %v1005_v21 }
 0x2f7   : > { %v2347_v13 = vpop.eup %1596  ;;  %1620 = vpow2.f32 %v903_v52  ;;  %v909_v48 = vmul.f32 1.442695, %v870_v7  ;;  %v864_v44 = vsub.f32 %v832_v43, %v2678_v54  ;;  %v833_v25 = vsub.f32 %v2679_v3, %v747_v16 }
 0x2f8   : > { %v2351_v61 = vpop.eup %1598  ;;  %1622 = vpow2.f32 %v905_v22  ;;  %v834_v2 = vsub.f32 %v2680_v10, %v747_v16  ;;  %v895_v19 = vmul.f32 1.442695, %v863_v1  ;;  %v1003_v57 = vsub.f32 %v2231_v51, %v2276_v60 }
 0x2f9   : > { %1624 = vpow2.f32 %v907_v8  ;;  %v897_v47 = vmul.f32 1.442695, %v864_v44  ;;  %v2358_v33 = vpop.eup %1600  ;;  %v865_v12 = vsub.f32 %v833_v25, %v2681_v55  ;;  %v1070_v28 = vmul.f32 %v2334_v59, %v2306_v37 }
 0x2fa   : > { %1626 = vpow2.f32 %v909_v48  ;;  %v866_v20 = vsub.f32 %v834_v2, %v2681_v55  ;;  %v2364_v17 = vpop.eup %1602  ;;  %v1004_v35 = vsub.f32 %v2236_v9, %v2276_v60  ;;  %v1001_v21 = vsub.f32 %v2226_v11, %v2276_v60 }
 0x2fb   : > { %1628 = vpow2.f32 %v895_v19  ;;  %v2372_v46 = vpop.eup %1604  ;;  %v899_v15 = vmul.f32 1.442695, %v865_v12  ;;  %v1031_v53 = vmul.f32 1.442695, %v1003_v57  ;;  %v1002_v4 = vsub.f32 %v2229_v5, %v2276_v60 }
 0x2fc   : > { %1630 = vpow2.f32 %v897_v47  ;;  %v901_v18 = vmul.f32 1.442695, %v866_v20  ;;  %v2374_v32 = vpop.eup %1606  ;;  %v1033_v51 = vmul.f32 1.442695, %v1004_v35  ;;  %v1027_v39 = vmul.f32 1.442695, %v1001_v21 }
 0x2fd   : > { %1632 = vpow2.f32 %v1035_v26  ;;  %v2378_v40 = vpop.eup %1608  ;;  %v999_v11 = vsub.f32 %v2221_v38, %v2276_v60  ;;  %v1000_v9 = vsub.f32 %v2224_v42, %v2276_v60  ;;  %v997_v52 = vsub.f32 %v2216_v14, %v2276_v60 }
 0x2fe   : > { %1634 = vpow2.f32 %v899_v15  ;;  %v2386_v22 = vpop.eup %1610  ;;  %v1029_v30 = vmul.f32 1.442695, %v1002_v4  ;;  %v998_v5 = vsub.f32 %v2219_v27, %v2276_v60  ;;  %v995_v7 = vsub.f32 %v2211_v62, %v2276_v60 }
 0x2ff   : > { %1636 = vpow2.f32 %v901_v18  ;;  %v2392_v36 = vpop.eup %1612  ;;  %v2394_v43 = vadd.f32 0.0001, %v1070_v28  ;;  %v1023_v38 = vmul.f32 1.442695, %v999_v11  ;;  %v1069_v14 = vmul.f32 %v2334_v59, %v2301_v56 }
 0x300   : > { %1638 = vpow2.f32 %v1031_v53  ;;  %v2396_v42 = vpop.eup %1614  ;;  %v1025_v8 = vmul.f32 1.442695, %v1000_v9  ;;  %v996_v16 = vsub.f32 %v2214_v6, %v2276_v60  ;;  %v1019_v62 = vmul.f32 1.442695, %v997_v52 }
 0x301   : > { %1640 = vpow2.f32 %v1033_v51  ;;  %v993_v48 = vsub.f32 %v2206_v50, %v2276_v60  ;;  %v994_v1 = vsub.f32 %v2209_v29, %v2276_v60  ;;  %v1021_v3 = vmul.f32 1.442695, %v998_v5 }
 0x302   : > { %v2402_v27 = vpop.eup %1616  ;;  %1642 = vpow2.f32 %v1027_v39  ;;  %v1015_v59 = vmul.f32 1.442695, %v995_v7  ;;  %v991_v25 = vsub.f32 %v2678_v54, %v2276_v60  ;;  %v1017_v6 = vmul.f32 1.442695, %v996_v16 }
 0x303   : > { %v2408_v44 = vpop.eup %1618  ;;  %1644 = vpow2.f32 %v1029_v30  ;;  %v992_v2 = vsub.f32 %v2681_v55, %v2276_v60  ;;  %v2417_v50 = vadd.f32 0.0001, %v2396_v42  ;;  %v1011_v29 = vmul.f32 1.442695, %v993_v48 }
 0x304   : > { %v2412_v10 = vpop.eup %1620  ;;  %1646 = vpow2.f32 %v1023_v38  ;;  %v1013_v47 = vmul.f32 1.442695, %v994_v1  ;;  %v2422_v26 = vadd.f32 0.0001, %v2408_v44  ;;  %v2430_v20 = vadd.f32 0.0001, %v2392_v36 }
 0x305   : > { %2682 = vst [vmem:[#allocation4_spill] sm:$0xff] %v2417_v50  ;;  %v2419_v19 = vpop.eup %1622  ;;  %1648 = vpow2.f32 %v1025_v8  ;;  %v2427_v54 = vadd.f32 0.0001, %v2412_v10  ;;  %v2433_v60 = vadd.f32 0.0001, %v2402_v27 }
 0x306   : > { %2683 = vst [vmem:[#allocation2_spill] sm:$0xff] %v2422_v26  ;;  %v2424_v12 = vpop.eup %1624  ;;  %1650 = vpow2.f32 %v1019_v62  ;;  %2685 = vst [vmem:[#allocation5_spill] sm:$0xff] %v2430_v20  ;;  %v2438_v57 = vadd.f32 0.0001, %v2419_v19  ;;  %v2453_v53 = vadd.f32 0.0001, %v2374_v32 }
 0x307   : > { %2684 = vst [vmem:[#allocation3_spill] sm:$0xff] %v2427_v54  ;;  %2686 = vst [vmem:[#allocation6_spill] sm:$0xff] %v2433_v60  ;;  %v2435_v55 = vpop.eup %1626  ;;  %1652 = vpow2.f32 %v1021_v3  ;;  %v2441_v28 = vadd.f32 0.0001, %v2424_v12  ;;  %v2456_v51 = vadd.f32 0.0001, %v2386_v22 }
 0x308   : > { %v2445_v21 = vpop.eup %1628  ;;  %v2448_v15 = vadd.f32 0.0001, %v2435_v55  ;;  %2688 = vst [vmem:[#allocation8_spill] sm:$0xff] %v2453_v53  ;;  %v1101_v39 = vadd.f32 0.0001, %v1069_v14  ;;  %1654 = vpow2.f32 %v1015_v59 }
 0x309   : > { %2687 = vst [vmem:[#allocation7_spill] sm:$0xff] %v2441_v28  ;;  %2689 = vst [vmem:[#allocation9_spill] sm:$0xff] %v2456_v51  ;;  %v2458_v4 = vpop.eup %1630  ;;  %v1009_v11 = vmul.f32 1.442695, %v992_v2  ;;  %1656 = vpow2.f32 %v1017_v6  ;;  %v1007_v30 = vmul.f32 1.442695, %v991_v25 }
 0x30a   : > { %v1633_v52 = vpop.eup %1632  ;;  %1658 = vpow2.f32 %v1011_v29  ;;  %v2471_v16 = vadd.f32 0.0001, %v2378_v40  ;;  %v2476_v48 = vadd.f32 0.0001, %v2445_v21  ;;  %v2482_v3 = vadd.f32 0.0001, %v2372_v46 }
 0x30b   : > { %v2466_v38 = vpop.eup %1634  ;;  %v1068_v8 = vmul.f32 %v1633_v52, %v2296_v58  ;;  %v1067_v14 = vmul.f32 %v1633_v52, %v2291_v34  ;;  %1660 = vpow2.f32 %v1013_v47  ;;  %v960_v2 = vadd.f32 0.0001, %v2458_v4 }
 0x30c   : > { %2690 = vst [vmem:[#allocation10_spill] sm:$0xff] %v2471_v16  ;;  %v2473_v62 = vpop.eup %1636  ;;  %v2479_v1 = vadd.f32 0.0001, %v2466_v38  ;;  %2691 = vst [vmem:[#allocation11_spill] sm:$0xff] %v2482_v3  ;;  %1662 = vpow2.f32 %v1009_v11 }
 0x30d   : > { %v1639_v59 = vpop.eup %1638  ;;  %v1100_v25 = vadd.f32 0.0001, %v1068_v8  ;;  %v1099_v6 = vadd.f32 0.0001, %v1067_v14  ;;  %1664 = vpow2.f32 %v1007_v30 }
 0x30e   : > { %v1641_v29 = vpop.eup %1640  ;;  %v1064_v52 = vmul.f32 %v1639_v59, %v2314_v23  ;;  %v1063_v47 = vmul.f32 %v1639_v59, %v2311_v45 }
 0x30f   : > { %v1643_v35 = vpop.eup %1642  ;;  %v1151_v9 = vpack.c.bf16 %v2394_v43, %v1100_v25  ;;  %v1150_v5 = vpack.c.bf16 %v1101_v39, %v1099_v6  ;;  %v1066_v8 = vmul.f32 %v1641_v29, %v2323_v63  ;;  %v1065_v14 = vmul.f32 %v1641_v29, %v2317_v41 }
 0x310   : > { %v1645_v11 = vpop.eup %1644  ;;  %v1096_v53 = vadd.f32 0.0001, %v1064_v52  ;;  %v1095_v51 = vadd.f32 0.0001, %v1063_v47  ;;  %v1060_v20 = vmul.f32 %v1643_v35, %v2337_v0  ;;  %v1059_v59 = vmul.f32 %v1643_v35, %v2329_v49 }
 0x311   : > { %v1647_v60 = vpop.eup %1646  ;;  %1168 = vmatprep.subr.bf16.mxu0 %v1151_v9  ;;  %v1098_v7 = vadd.f32 0.0001, %v1066_v8  ;;  %v1097_v50 = vadd.f32 0.0001, %v1065_v14  ;;  %v1062_v18 = vmul.f32 %v1645_v11, %v2345_v24  ;;  %v1061_v43 = vmul.f32 %v1645_v11, %v2340_v31 }
 0x312   : > { %v1649_v39 = vpop.eup %1648  ;;  %1169 = vmatpush1.bf16.msra.mxu0 %v1150_v5  ;;  %v1092_v25 = vadd.f32 0.0001, %v1060_v20  ;;  %v1091_v6 = vadd.f32 0.0001, %v1059_v59  ;;  %v962_v29 = vadd.f32 0.0001, %v2473_v62  ;;  %v1056_v35 = vmul.f32 %v1647_v60, %v2351_v61 }
 0x313   : > { %v1651_v52 = vpop.eup %1650  ;;  %v1149_v47 = vpack.c.bf16 %v1098_v7, %v1096_v53  ;;  %v1094_v3 = vadd.f32 0.0001, %v1062_v18  ;;  %v1055_v9 = vmul.f32 %v1647_v60, %v2347_v13  ;;  %v1148_v14 = vpack.c.bf16 %v1097_v50, %v1095_v51 }
 0x314   : > { %v1653_v8 = vpop.eup %1652  ;;  %v1093_v16 = vadd.f32 0.0001, %v1061_v43  ;;  %v1058_v26 = vmul.f32 %v1649_v39, %v2364_v17  ;;  %v1057_v11 = vmul.f32 %v1649_v39, %v2358_v33  ;;  %v1153_v53 = vpack.c.bf16 %v962_v29, %v960_v2 }
 0x315   : > { %1170 = vmatprep.subr.bf16.mxu0 %v1149_v47  ;;  %v1147_v20 = vpack.c.bf16 %v1094_v3, %v1092_v25  ;;  %v1054_v5 = vmul.f32 %v1653_v8, %v2386_v22  ;;  %v1655_v59 = vpop.eup %1654  ;;  %v1088_v7 = vadd.f32 0.0001, %v1056_v35  ;;  %v1087_v54 = vadd.f32 0.0001, %v1055_v9 }
 0x316   : > { %1171 = vmatpush1.bf16.msra.mxu0 %v1148_v14  ;;  %v1090_v30 = vadd.f32 0.0001, %v1058_v26  ;;  %v1657_v18 = vpop.eup %1656  ;;  %v1052_v60 = vmul.f32 %v1651_v52, %v2374_v32  ;;  %v1053_v50 = vmul.f32 %v1653_v8, %v2378_v40  ;;  %v1146_v43 = vpack.c.bf16 %v1093_v16, %v1091_v6  ;;  %1245 = vmatprep.mubr.bf16.mxu1 %v1153_v53 }
 0x317   : > { %1172 = vmatprep.subr.bf16.mxu0 %v1147_v20  ;;  %v1659_v51 = vpop.eup %1658  ;;  %v1089_v28 = vadd.f32 0.0001, %v1057_v11  ;;  %v1051_v3 = vmul.f32 %v1651_v52, %v2372_v46  ;;  %v1050_v22 = vmul.f32 %v1657_v18, %v2408_v44  ;;  %v1086_v26 = vadd.f32 0.0001, %v1054_v5 }
 0x318   : > { %v1661_v39 = vpop.eup %1660  ;;  %v1145_v25 = vpack.c.bf16 %v1090_v30, %v1088_v7  ;;  %v1085_v2 = vadd.f32 0.0001, %v1053_v50  ;;  %v1048_v29 = vmul.f32 %v1655_v59, %v2396_v42  ;;  %v1047_v32 = vmul.f32 %v1655_v59, %v2392_v36 }
 0x319   : > { %v1663_v47 = vpop.eup %1662  ;;  %v1049_v40 = vmul.f32 %v1657_v18, %v2402_v27  ;;  %v1044_v16 = vmul.f32 %v1659_v51, %v2419_v19  ;;  %v1046_v6 = vmul.f32 %v1661_v39, %v2435_v55  ;;  %v1084_v46 = vadd.f32 0.0001, %v1052_v60 }
 0x31a   : > { %1173 = vmatpush1.bf16.msra.mxu0 %v1146_v43  ;;  %v1082_v52 = vadd.f32 0.0001, %v1050_v22  ;;  %v1045_v44 = vmul.f32 %v1661_v39, %v2424_v12  ;;  %v1144_v35 = vpack.c.bf16 %v1089_v28, %v1087_v54  ;;  %v1083_v9 = vadd.f32 0.0001, %v1051_v3  ;;  %v1665_v55 = vpop.eup %1664 }
 0x31b   : > { %1174 = vmatprep.subr.bf16.mxu0 %v1145_v25  ;;  %v1081_v8 = vadd.f32 0.0001, %v1049_v40  ;;  %v1078_v14 = vadd.f32 0.0001, %v1046_v6  ;;  %v1143_v42 = vpack.c.bf16 %v1086_v26, %v1084_v46  ;;  %v1080_v11 = vadd.f32 0.0001, %v1048_v29  ;;  %v1119_v40 = vpop.trf.xlu0 }
 0x31c   : > { %v1042_v20 = vmul.f32 %v1663_v47, %v2473_v62  ;;  %v1142_v36 = vpack.c.bf16 %v1085_v2, %v1083_v9  ;;  %v1079_v27 = vadd.f32 0.0001, %v1047_v32  ;;  %v1076_v5 = vadd.f32 0.0001, %v1044_v16 }
 0x31d   : > { %v2516_v19 = vadd.f32 0.0001, %v2351_v61  ;;  %v1141_v59 = vpack.c.bf16 %v1082_v52, %v1080_v11  ;;  %v1043_v12 = vmul.f32 %v1659_v51, %v2412_v10  ;;  %v1077_v54 = vadd.f32 0.0001, %v1045_v44  ;;  %v2697_v11 = vld [vmem:[#allocation2_spill] sm:$0xff] }
 0x31e   : > { %1175 = vmatpush1.bf16.msra.mxu0 %v1144_v35  ;;  %v978_v28 = vadd.f32 0.0001, %v2364_v17  ;;  %v1140_v30 = vpack.c.bf16 %v1081_v8, %v1079_v27  ;;  %v1139_v53 = vpack.c.bf16 %v1078_v14, %v1076_v5  ;;  %v1040_v18 = vmul.f32 %v1665_v55, %v2458_v4  ;;  %v2694_v8 = vld [vmem:[#allocation7_spill] sm:$0xff]  ;;  %v2700_v27 = vld [vmem:[#allocation6_spill] sm:$0xff]  ;;  %v2701_v5 = vld [vmem:[#allocation5_spill] sm:$0xff] }
 0x31f   : > { %1176 = vmatprep.subr.bf16.mxu0 %v1143_v42  ;;  %v1074_v62 = vadd.f32 0.0001, %v1042_v20  ;;  %v975_v60 = vadd.f32 0.0001, %v2347_v13  ;;  %v977_v61 = vadd.f32 0.0001, %v2358_v33  ;;  %v1041_v43 = vmul.f32 %v1663_v47, %v2466_v38 }
 0x320   : > { %v1161_v7 = vpack.c.bf16 %v978_v28, %v2516_v19  ;;  %v980_v50 = vadd.f32 0.0001, %v2337_v0  ;;  %v982_v10 = vadd.f32 0.0001, %v2345_v24  ;;  %v979_v17 = vadd.f32 0.0001, %v2329_v49 }
 0x321   : > { %v981_v51 = vadd.f32 0.0001, %v2340_v31  ;;  %v1160_v4 = vpack.c.bf16 %v977_v61, %v975_v60  ;;  %v984_v3 = vadd.f32 0.0001, %v2314_v23  ;;  %v986_v22 = vadd.f32 0.0001, %v2323_v63 }
 0x322   : > { %1177 = vmatpush1.bf16.msra.mxu0 %v1142_v36  ;;  %v983_v13 = vadd.f32 0.0001, %v2311_v45  ;;  %v1163_v33 = vpack.c.bf16 %v982_v10, %v980_v50  ;;  %v985_v0 = vadd.f32 0.0001, %v2317_v41  ;;  %v988_v38 = vadd.f32 0.0001, %v2296_v58 }
 0x323   : > { %1178 = vmatprep.subr.bf16.mxu0 %v1141_v59  ;;  %v1162_v39 = vpack.c.bf16 %v981_v51, %v979_v17  ;;  %v1165_v25 = vpack.c.bf16 %v986_v22, %v984_v3  ;;  %v990_v24 = vadd.f32 0.0001, %v2306_v37  ;;  %v987_v49 = vadd.f32 0.0001, %v2291_v34  ;;  %v2695_v14 = vld [vmem:[#allocation3_spill] sm:$0xff]  ;;  %v2698_v20 = vld [vmem:[#allocation4_spill] sm:$0xff] }
 0x324   : > { %v989_v31 = vadd.f32 0.0001, %v2301_v56  ;;  %v1075_v26 = vadd.f32 0.0001, %v1043_v12  ;;  %v1039_v23 = vmul.f32 %v1665_v55, %v2445_v21  ;;  %v1164_v63 = vpack.c.bf16 %v985_v0, %v983_v13  ;;  %v2703_v55 = vld [vmem:[#allocation9_spill] sm:$0xff]  ;;  %v2704_v59 = vld [vmem:[#allocation8_spill] sm:$0xff] }
 0x325   : > { %v1072_v45 = vadd.f32 0.0001, %v1040_v18  ;;  %v1167_v2 = vpack.c.bf16 %v990_v24, %v988_v38  ;;  %v1073_v41 = vadd.f32 0.0001, %v1041_v43  ;;  %v1708_v34 = vmov 1.0   ;;  %v2707_v12 = vld [vmem:[#allocation11_spill] sm:$0xff] }
 0x326   : > { %1179 = vmatpush1.bf16.msra.mxu0 %v1140_v30  ;;  %v1166_v29 = vpack.c.bf16 %v989_v31, %v987_v49  ;;  %v1138_v47 = vpack.c.bf16 %v1077_v54, %v1075_v26  ;;  %v1071_v58 = vadd.f32 0.0001, %v1039_v23  ;;  %v1135_v16 = vpack.c.bf16 %v1708_v34, %v1119_v40 }
 0x327   : > { %1180 = vmatprep.subr.bf16.mxu0 %v1139_v53  ;;  %v1137_v32 = vpack.c.bf16 %v1074_v62, %v1072_v45  ;;  %v2692_v35 = vpack.c.bf16 %v2479_v1, %v2476_v48  ;;  %v2693_v9 = vpack.c.bf16 %v2448_v15, %v2438_v57  ;;  %v2696_v42 = vpack.c.bf16 %v2694_v8, %v2695_v14  ;;  %v2706_v1 = vld [vmem:[#allocation10_spill] sm:$0xff] }
 0x328   : > { %v1136_v37 = vpack.c.bf16 %v1073_v41, %v1071_v58  ;;  %v2699_v36 = vpack.c.bf16 %v2697_v11, %v2698_v20  ;;  %v2702_v19 = vpack.c.bf16 %v2700_v27, %v2701_v5  ;;  %v2705_v48 = vpack.c.bf16 %v2703_v55, %v2704_v59 }
 0x329   : > { %v2708_v57 = vpack.c.bf16 %v2706_v1, %v2707_v12  ;;  %v1709_v15 = vmov 8  }
 0x32a   : > { %1181 = vmatpush1.bf16.msra.mxu0 %v1138_v47  ;;  %1536 = vset.pattern.permute.xlu1 %v1709_v15 }
 0x32b   : > { %1182 = vmatprep.subr.bf16.mxu0 %v1137_v32  ;;  %1537 = vset.pattern.permute.xlu0 %v1709_v15 }
 0x32e   : > { %1183 = vmatpush1.bf16.msra.mxu0 %v1136_v37 }
 0x331   : > { %1201 = vmatmul.mubr.bf16.vlgmr.msra.gmra.mxu0 %v1135_v16 }
 0x3f1   : > { %v1202_v56 = vpop.f32.mrf.mxu0 }
 0x3f3   : > { %v1204_v6 = vpop.f32.mrf.mxu0 }
 0x3f5   : > { %v1206_v21 = vpop.f32.mrf.mxu0 }
 0x3f6   : > { %v1211_v44 = vpack.c.bf16 %v1206_v21, %v1202_v56 }
 0x3f7   : > { %v1208_v46 = vpop.f32.mrf.mxu0 }
 0x3f8   : > { %v1212_v52 = vpack.c.bf16 %v1208_v46, %v1204_v6 }
 0x3fa   : > { %1227 = vmatprep.subr.bf16.mxu1 %v1212_v52 }
 0x3fb   : > { %1228 = vmatpush1.bf16.xpose.msra.mxu1 %v1211_v44 }
 0x402   : > { %1246 = vmatmul.mubr.bf16.vlgmr.msra.gmra.mxu1 %v2692_v35 }
 0x403   : > { %1253 = vmatprep.mubr.bf16.mxu1 %v2693_v9 }
 0x40a   : > { %1254 = vmatmul.mubr.bf16.gmra.mxu1 %v2696_v42 }
 0x40b   : > { %1261 = vmatprep.mubr.bf16.mxu1 %v2699_v36 }
 0x412   : > { %1262 = vmatmul.mubr.bf16.gmra.mxu1 %v2702_v19 }
 0x413   : > { %1269 = vmatprep.mubr.bf16.mxu1 %v2705_v48 }
 0x41a   : > { %1270 = vmatmul.mubr.bf16.gmra.mxu1 %v2708_v57 }
 0x41b   : > { %1277 = vmatprep.mubr.bf16.mxu1 %v1161_v7 }
 0x422   : > { %1278 = vmatmul.mubr.bf16.gmra.mxu1 %v1160_v4 }
 0x423   : > { %1285 = vmatprep.mubr.bf16.mxu1 %v1163_v33 }
 0x42a   : > { %1286 = vmatmul.mubr.bf16.gmra.mxu1 %v1162_v39 }
 0x42b   : > { %1293 = vmatprep.mubr.bf16.mxu1 %v1165_v25 }
 0x432   : > { %1294 = vmatmul.mubr.bf16.gmra.mxu1 %v1164_v63 }
 0x433   : > { %1301 = vmatprep.mubr.bf16.mxu1 %v1167_v2 }
 0x43a   : > { %1302 = vmatmul.mubr.bf16.gmra.mxu1 %v1166_v29 }
 0x4c2   : > { %v2559_v54 = vpop.f32.mrf.mxu1 }
 0x4c3   : > { %1666 = vrcp.f32 %v2559_v54 }
 0x4c4   : > { %v1249_v28 = vpop.f32.mrf.mxu1 }
 0x4c6   : > { %v2562_v30 = vpop.f32.mrf.mxu1 }
 0x4c7   : > { %1668 = vrcp.f32 %v2562_v30 }
 0x4c8   : > { %v1252_v53 = vpop.f32.mrf.mxu1 }
 0x4ca   : > { %v2565_v18 = vpop.f32.mrf.mxu1 }
 0x4cb   : > { %1670 = vrcp.f32 %v2565_v18 }
 0x4cc   : > { %v1257_v62 = vpop.f32.mrf.mxu1 }
 0x4ce   : > { %v2568_v7 = vpop.f32.mrf.mxu1 }
 0x4cf   : > { %1672 = vrcp.f32 %v2568_v7 }
 0x4d0   : > { %v1667_v60 = vpop.eup %1666  ;;  %v1260_v61 = vpop.f32.mrf.mxu1 }
 0x4d1   : > { %1328 = vperm.xlu1 %1536, %v1667_v60  }
 0x4d2   : > { %v2571_v50 = vpop.f32.mrf.mxu1 }
 0x4d3   : > { %1674 = vrcp.f32 %v2571_v50 }
 0x4d4   : > { %v1669_v43 = vpop.eup %1668  ;;  %v1265_v10 = vpop.f32.mrf.mxu1 }
 0x4d5   : > { %1333 = vperm.xlu1 %1536, %v1669_v43  }
 0x4d6   : > { %v2574_v17 = vpop.f32.mrf.mxu1 }
 0x4d7   : > { %1676 = vrcp.f32 %v2574_v17 }
 0x4d8   : > { %v1671_v51 = vpop.eup %1670  ;;  %v1268_v4 = vpop.f32.mrf.mxu1 }
 0x4d9   : > { %1338 = vperm.xlu1 %1536, %v1671_v51  }
 0x4da   : > { %v2577_v3 = vpop.f32.mrf.mxu1 }
 0x4db   : > { %1678 = vrcp.f32 %v2577_v3 }
 0x4dc   : > { %v1673_v22 = vpop.eup %1672  ;;  %v1273_v13 = vpop.f32.mrf.mxu1 }
 0x4dd   : > { %1343 = vperm.xlu1 %1536, %v1673_v22  }
 0x4de   : > { %v2580_v33 = vpop.f32.mrf.mxu1 }
 0x4df   : > { %1680 = vrcp.f32 %v2580_v33 }
 0x4e0   : > { %v1675_v39 = vpop.eup %1674  ;;  %v1276_v0 = vpop.f32.mrf.mxu1 }
 0x4e1   : > { %1348 = vperm.xlu1 %1536, %v1675_v39  }
 0x4e2   : > { %v2583_v38 = vpop.f32.mrf.mxu1 }
 0x4e3   : > { %1682 = vrcp.f32 %v2583_v38 }
 0x4e4   : > { %v1677_v25 = vpop.eup %1676  ;;  %v1281_v24 = vpop.f32.mrf.mxu1 }
 0x4e5   : > { %1353 = vperm.xlu1 %1536, %v1677_v25  }
 0x4e6   : > { %v2586_v49 = vpop.f32.mrf.mxu1 }
 0x4e7   : > { %1684 = vrcp.f32 %v2586_v49 }
 0x4e8   : > { %v1679_v31 = vpop.eup %1678  ;;  %v1284_v26 = vpop.f32.mrf.mxu1 }
 0x4e9   : > { %1358 = vperm.xlu1 %1536, %v1679_v31  }
 0x4ea   : > { %v2589_v23 = vpop.f32.mrf.mxu1 }
 0x4eb   : > { %1686 = vrcp.f32 %v2589_v23 }
 0x4ec   : > { %v1681_v63 = vpop.eup %1680  ;;  %v1289_v45 = vpop.f32.mrf.mxu1 }
 0x4ed   : > { %1363 = vperm.xlu1 %1536, %v1681_v63  }
 0x4ee   : > { %v2592_v2 = vpop.f32.mrf.mxu1 }
 0x4ef   : > { %1688 = vrcp.f32 %v2592_v2 }
 0x4f0   : > { %v1683_v29 = vpop.eup %1682  ;;  %v1292_v47 = vpop.f32.mrf.mxu1 }
 0x4f1   : > { %1368 = vperm.xlu1 %1536, %v1683_v29  }
 0x4f2   : > { %v2595_v41 = vpop.f32.mrf.mxu1 }
 0x4f3   : > { %1690 = vrcp.f32 %v2595_v41 }
 0x4f4   : > { %v1685_v32 = vpop.eup %1684  ;;  %v1297_v58 = vpop.f32.mrf.mxu1 }
 0x4f5   : > { %1373 = vperm.xlu1 %1536, %v1685_v32  }
 0x4f6   : > { %v1298_v40 = vpop.f32.mrf.mxu1 }
 0x4f7   : > { %1692 = vrcp.f32 %v1298_v40 }
 0x4f8   : > { %v1687_v37 = vpop.eup %1686  ;;  %v1300_v34 = vpop.f32.mrf.mxu1 }
 0x4f9   : > { %1378 = vperm.xlu1 %1536, %v1687_v37  }
 0x4fa   : > { %v1303_v16 = vpop.f32.mrf.mxu1 }
 0x4fb   : > { %1694 = vrcp.f32 %v1303_v16 }
 0x4fc   : > { %v1689_v56 = vpop.eup %1688  ;;  %v1305_v6 = vpop.f32.mrf.mxu1 }
 0x4fd   : > { %1383 = vperm.xlu1 %1536, %v1689_v56  }
 0x4fe   : > { %v1306_v21 = vpop.f32.mrf.mxu1 }
 0x4ff   : > { %1696 = vrcp.f32 %v1306_v21 }
 0x500   : > { %v1691_v46 = vpop.eup %1690  ;;  %v1308_v52 = vpop.f32.mrf.mxu1 }
 0x501   : > { %1388 = vperm.xlu1 %1536, %v1691_v46  }
 0x504   : > { %v1693_v44 = vpop.eup %1692 }
 0x505   : > { %1393 = vperm.xlu1 %1536, %v1693_v44  }
 0x508   : > { %v1695_v35 = vpop.eup %1694 }
 0x509   : > { %1398 = vperm.xlu1 %1536, %v1695_v35  }
 0x50c   : > { %v1697_v9 = vpop.eup %1696 }
 0x50d   : > { %1403 = vperm.xlu1 %1536, %v1697_v9  }
 0x54c   : > { %v1329_v8 = vpop.permute.xlu1 %1328 }
 0x54d   : > { %v1406_v14 = vmul.f32 %v1329_v8, %v2559_v54 }
 0x54f   : > { %1422 = vst.msk [vmem:[%s2603_s5] sm:$0xff] %vm217_vm0, %v1406_v14 }
 0x550   : > { %v1334_v42 = vpop.permute.xlu1 %1333 }
 0x551   : > { %v1407_v11 = vmul.f32 %v1334_v42, %v2562_v30 }
 0x553   : > { %1423 = vst.msk [vmem:[%s2603_s5 + $0x8] sm:$0xff] %vm217_vm0, %v1407_v11 }
 0x554   : > { %v1339_v20 = vpop.permute.xlu1 %1338 }
 0x555   : > { %v1408_v36 = vmul.f32 %v1339_v20, %v2565_v18 }
 0x557   : > { %1424 = vst.msk [vmem:[%s2603_s5 + $0x10] sm:$0xff] %vm217_vm0, %v1408_v36 }
 0x558   : > { %v1344_v27 = vpop.permute.xlu1 %1343 }
 0x559   : > { %v1409_v5 = vmul.f32 %v1344_v27, %v2568_v7 }
 0x55b   : > { %1425 = vst.msk [vmem:[%s2603_s5 + $0x18] sm:$0xff] %vm217_vm0, %v1409_v5 }
 0x55c   : > { %v1349_v19 = vpop.permute.xlu1 %1348 }
 0x55d   : > { %v1410_v55 = vmul.f32 %v1349_v19, %v2571_v50 }
 0x55f   : > { %1426 = vst.msk [vmem:[%s2603_s5 + $0x20] sm:$0xff] %vm217_vm0, %v1410_v55 }
 0x560   : > { %v1354_v59 = vpop.permute.xlu1 %1353 }
 0x561   : > { %v1411_v48 = vmul.f32 %v1354_v59, %v2574_v17 }
 0x563   : > { %1427 = vst.msk [vmem:[%s2603_s5 + $0x28] sm:$0xff] %vm217_vm0, %v1411_v48 }
 0x564   : > { %v1359_v1 = vpop.permute.xlu1 %1358 }
 0x565   : > { %v1412_v12 = vmul.f32 %v1359_v1, %v2577_v3 }
 0x567   : > { %1428 = vst.msk [vmem:[%s2603_s5 + $0x30] sm:$0xff] %vm217_vm0, %v1412_v12 }
 0x568   : > { %v1364_v57 = vpop.permute.xlu1 %1363 }
 0x569   : > { %v1413_v15 = vmul.f32 %v1364_v57, %v2580_v33 }
 0x56b   : > { %1429 = vst.msk [vmem:[%s2603_s5 + $0x38] sm:$0xff] %vm217_vm0, %v1413_v15 }
 0x56c   : > { %v1369_v54 = vpop.permute.xlu1 %1368 }
 0x56d   : > { %v1414_v28 = vmul.f32 %v1369_v54, %v2583_v38 }
 0x56f   : > { %1430 = vst.msk [vmem:[%s2603_s5 + $0x40] sm:$0xff] %vm217_vm0, %v1414_v28 }
 0x570   : > { %v1374_v30 = vpop.permute.xlu1 %1373 }
 0x571   : > { %v1415_v53 = vmul.f32 %v1374_v30, %v2586_v49 }
 0x573   : > { %1431 = vst.msk [vmem:[%s2603_s5 + $0x48] sm:$0xff] %vm217_vm0, %v1415_v53 }
 0x574   : > { %v1379_v18 = vpop.permute.xlu1 %1378 }
 0x575   : > { %v1416_v62 = vmul.f32 %v1379_v18, %v2589_v23 }
 0x577   : > { %1432 = vst.msk [vmem:[%s2603_s5 + $0x50] sm:$0xff] %vm217_vm0, %v1416_v62 }
 0x578   : > { %v1384_v7 = vpop.permute.xlu1 %1383 }
 0x579   : > { %v1417_v60 = vmul.f32 %v1384_v7, %v2592_v2 }
 0x57b   : > { %1433 = vst.msk [vmem:[%s2603_s5 + $0x58] sm:$0xff] %vm217_vm0, %v1417_v60 }
 0x57c   : > { %v1389_v61 = vpop.permute.xlu1 %1388 }
 0x57d   : > { %v1418_v50 = vmul.f32 %v1389_v61, %v2595_v41 }
 0x57f   : > { %1434 = vst.msk [vmem:[%s2603_s5 + $0x60] sm:$0xff] %vm217_vm0, %v1418_v50 }
 0x580   : > { %v1394_v43 = vpop.permute.xlu1 %1393 }
 0x581   : > { %v1419_v10 = vmul.f32 %v1394_v43, %v1298_v40 }
 0x583   : > { %1435 = vst.msk [vmem:[%s2603_s5 + $0x68] sm:$0xff] %vm217_vm0, %v1419_v10 }
 0x584   : > { %v1399_v17 = vpop.permute.xlu1 %1398 }
 0x585   : > { %v1420_v51 = vmul.f32 %v1399_v17, %v1303_v16 }
 0x587   : > { %1436 = vst.msk [vmem:[%s2603_s5 + $0x70] sm:$0xff] %vm217_vm0, %v1420_v51 }
 0x588   : > { %v1404_v4 = vpop.permute.xlu1 %1403 }
 0x589   : > { %v1421_v3 = vmul.f32 %v1404_v4, %v1306_v21 }
 0x58b   : > { %1437 = vst.msk [vmem:[%s2603_s5 + $0x78] sm:$0xff] %vm217_vm0, %v1421_v3 }
 0x58c PF: > { %s14_s15 = sadd.s32 1, %s1704_s15  }
 0x58d   : > { %p11_p4 = scmp.ge.s32.totalorder %s14_s15, 4  }
 0x58f   :  { %13 = sbr.rel (!%p11_p4) target bundleno = 1 (0x1), region = 66 }

</bundles_post_ra>
